<compile_context>
chip_gen: v6e
topology: v6e:2x2x1
jax: 0.10.0
libtpu: 0.0.40
codegen_flags: <defaults>
</compile_context>

<pallas_src>
import functools

import jax
import jax.numpy as jnp
from jax import lax
from jax.experimental import pallas as pl
from jax.experimental.pallas import tpu as pltpu

GROUPS = 8
EPS = 1e-5  # PyTorch GroupNorm default eps


def _silu(v):
    # sigmoid via tanh: the transcendental runs in the otherwise-idle EUP slot
    # instead of a multi-op VALU divide/Newton sequence.
    return v * (0.5 * (jnp.tanh(0.5 * v) + 1.0))


def _resnet_block_kernel(x_ref, temb_ref, w1_ref, w2_ref, wr_ref, p_ref,
                         gsel_ref, mask_ref, out_ref, col_ref, *, W):
    """One batch element per program.  Layout: (channels, H*W) lane-dense."""
    Cin_p, HW = x_ref.shape
    Cout = out_ref.shape[0]
    Cmax = mask_ref.shape[1]
    b = pl.program_id(0)
    f32 = jnp.float32

    # ---- packed per-channel params: columns [b1, g1, be1, b2, g2, be2, br] ----
    pv = p_ref[...]                                      # (Cout, 7)
    b1, g1, be1 = pv[:, 0:1], pv[:, 1:2], pv[:, 2:3]
    b2, g2, be2 = pv[:, 3:4], pv[:, 4:5], pv[:, 5:6]
    br = pv[:, 6:7]

    # ---- per-batch time embedding (precomputed in the wrapper): column select --
    t_all = temb_ref[...]                                # (2*Cout, B)
    bsel = lax.broadcasted_iota(jnp.int32, (1, t_all.shape[1]), 1) == b
    temb = jnp.sum(jnp.where(bsel, t_all, 0.0), axis=1, keepdims=True)  # (2Cout,1)
    scale = temb[:Cout]                                  # (Cout, 1)
    shift = temb[Cout:]                                  # (Cout, 1)

    def conv3x3(src, w_flat_ref, bias):
        # src: (C, HW).  The 9 taps (lane-rolled + boundary-masked copies of
        # src, i.e. in-register im2col) are written straight into the persistent
        # scratch, then contracted against (Cout, 9*C) weights in ONE matmul.
        C = src.shape[0]
        for ky in range(3):
            for kx in range(3):
                k = ky * 3 + kx
                off = (ky - 1) * W + (kx - 1)
                r = src if off == 0 else pltpu.roll(src, shift=(-off) % HW, axis=1)
                if k != 4:                               # center tap needs no mask
                    mk = mask_ref[k]                     # (Cmax, HW), pre-broadcast
                    r = r * (mk if C == Cmax else mk[:C, :])
                col_ref[k * C:(k + 1) * C, :] = r
        return jnp.dot(w_flat_ref[...], col_ref[0:9 * C, :],
                       preferred_element_type=f32) + bias

    def gn_affine(h, gamma, beta):
        # Returns (A, B) with GroupNorm(h) == h * A + B, A/B shaped (Cout, 1).
        # gsel (constant, built in wrapper) maps [channel sums; channel sumsq]
        # -> per-channel group [mean; E[x^2]] in a single tiny matvec.
        s = jnp.sum(h, axis=1, keepdims=True)            # (Cout, 1)
        sq = jnp.sum(h * h, axis=1, keepdims=True)       # (Cout, 1)
        m = jnp.dot(gsel_ref[...], jnp.concatenate([s, sq], axis=0),
                    preferred_element_type=f32)          # (2*Cout, 1)
        mean_c = m[:Cout]
        # NOTE: single-pass variance (E[x^2] - E[x]^2); fine at these toy
        # magnitudes, switch to two-pass before reusing at real scales.
        inv_c = lax.rsqrt(m[Cout:] - mean_c * mean_c + EPS)
        A = inv_c * gamma
        return A, beta - mean_c * A

    x = x_ref[...]                                       # (Cin_p, HW)

    # ---- block1: conv3x3 -> GN (time scale/shift folded into affine) -> SiLU ----
    h = conv3x3(x, w1_ref, b1)                           # (Cout, HW)
    A1, B1 = gn_affine(h, g1, be1)
    A1 = A1 * (1.0 + scale)
    B1 = B1 * (1.0 + scale) + shift
    h = _silu(h * A1 + B1)

    # ---- block2: conv3x3 -> GN -> SiLU ----
    h2 = conv3x3(h, w2_ref, b2)
    A2, B2 = gn_affine(h2, g2, be2)
    h2 = _silu(h2 * A2 + B2)

    # ---- residual 1x1 conv on the already-resident input block ----
    # TODO(synk): the PyTorch module uses nn.Identity when dim == dim_out; this
    # kernel always applies the 1x1 res-conv (pass an identity weight for that case).
    res = jnp.dot(wr_ref[...], x, preferred_element_type=f32) + br

    out_ref[...] = (h2 + res).astype(out_ref.dtype)      # (Cout, HW) lane-dense


def resnet_block_forward(x_nchw, time_emb, p):
    """ResnetBlock.forward(x, time_emb). x_nchw: (B, Cin, H, W) -> (B, Cout, H, W)."""
    B, Cin, H, W = x_nchw.shape
    Cout = p['b1'].shape[0]
    HW = H * W
    Cg = Cout // GROUPS

    # pad input channels to a sublane multiple so tap stacking is 8-row aligned
    Cin_p = ((Cin + 7) // 8) * 8
    Cmax = max(Cin_p, Cout)

    # ---- glue: NCHW -> (C, B*HW) (channels on sublanes, flat spatial on lanes) --
    x_cn = jnp.transpose(x_nchw, (1, 0, 2, 3)).reshape(Cin, B * HW)
    x_cn = jnp.pad(x_cn, ((0, Cin_p - Cin), (0, 0)))

    # ---- time MLP computed ONCE here (one XLA matmul), not inside the kernel ----
    temb_t = (jax.nn.silu(time_emb) @ p['mlp_w'].T + p['mlp_b']).T       # (2*Cout, B)

    # ---- weights / per-channel params in kernel-friendly layouts ----
    w1f = jnp.pad(jnp.transpose(p['w1'], (0, 2, 3, 1)),                  # (Cout,3,3,Cin)
                  ((0, 0), (0, 0), (0, 0), (0, Cin_p - Cin))
                  ).reshape(Cout, 9 * Cin_p)                             # (Cout, 9*Cin_p)
    w2f = jnp.transpose(p['w2'], (0, 2, 3, 1)).reshape(Cout, 9 * Cout)
    wrp = jnp.pad(p['wr'][:, :, 0, 0], ((0, 0), (0, Cin_p - Cin)))       # (Cout, Cin_p)
    pvec = jnp.stack([p['b1'], p['g1'], p['be1'],
                      p['b2'], p['g2'], p['be2'], p['br']], axis=1)      # (Cout, 7)

    # ---- grid-invariant constants, built once here (never rebuilt per step) ----
    # GroupNorm selector: [channel sums; sumsq] -> per-channel group [mean; E[x^2]]
    cidx = jnp.arange(Cout)
    same_group = (cidx[:, None] // Cg) == (cidx[None, :] // Cg)
    mblk = jnp.where(same_group, 1.0 / float(Cg * HW), 0.0).astype(jnp.float32)
    zblk = jnp.zeros_like(mblk)
    gsel = jnp.block([[mblk, zblk], [zblk, mblk]])                       # (2Cout, 2Cout)

    # 3x3-conv boundary masks, pre-broadcast to sublane-tile shape (Cmax, HW)
    pos = jnp.arange(HW, dtype=jnp.int32)
    xc, yr = pos % W, pos // W
    mrows = []
    for ky in range(3):
        for kx in range(3):
            dy, dx = ky - 1, kx - 1
            mrows.append(((xc + dx >= 0) & (xc + dx < W) &
                          (yr + dy >= 0) & (yr + dy < H)).astype(jnp.float32))
    maskf = jnp.broadcast_to(jnp.stack(mrows)[:, None, :], (9, Cmax, HW))

    kernel = functools.partial(_resnet_block_kernel, W=W)

    out_cn = pl.pallas_call(
        kernel,
        out_shape=jax.ShapeDtypeStruct((Cout, B * HW), jnp.float32),
        grid=(B,),
        in_specs=[
            pl.BlockSpec((Cin_p, HW), lambda b: (0, b)),   # per-batch activation block
            pl.BlockSpec(temb_t.shape, lambda b: (0, 0)),  # constants below: same
            pl.BlockSpec(w1f.shape, lambda b: (0, 0)),     #   block every step ->
            pl.BlockSpec(w2f.shape, lambda b: (0, 0)),     #   fetched once, stay
            pl.BlockSpec(wrp.shape, lambda b: (0, 0)),     #   resident in VMEM
            pl.BlockSpec(pvec.shape, lambda b: (0, 0)),
            pl.BlockSpec(gsel.shape, lambda b: (0, 0)),
            pl.BlockSpec(maskf.shape, lambda b: (0, 0, 0)),
        ],
        out_specs=pl.BlockSpec((Cout, HW), lambda b: (0, b)),
        scratch_shapes=[pltpu.VMEM((9 * Cmax, HW), jnp.float32)],  # im2col, reused
        compiler_params=pltpu.CompilerParams(
            dimension_semantics=("parallel",)),            # batch across 2 TCs on v7x
    )(x_cn, temb_t, w1f, w2f, wrp, pvec, gsel, maskf)

    return jnp.transpose(out_cn.reshape(Cout, B, H, W), (1, 0, 2, 3))    # back to NCHW


def reference_forward(x, t, p):
    """PyTorch-faithful NCHW reference in plain JAX (for correctness check)."""
    Cout = p['b1'].shape[0]
    temb = jax.nn.silu(t) @ p['mlp_w'].T + p['mlp_b']       # (B, 2*Cout)
    scale = temb[:, :Cout][:, :, None, None]
    shift = temb[:, Cout:][:, :, None, None]

    def conv(xx, w, b, pad):
        y = lax.conv_general_dilated(xx, w, (1, 1), [(pad, pad), (pad, pad)],
                                     dimension_numbers=('NCHW', 'OIHW', 'NCHW'))
        return y + b[None, :, None, None]

    def gn(xx, gamma, beta):
        B, C, H, W = xx.shape
        xg = xx.reshape(B, GROUPS, -1)
        mu = xg.mean(axis=2, keepdims=True)
        var = ((xg - mu) ** 2).mean(axis=2, keepdims=True)
        xn = ((xg - mu) / jnp.sqrt(var + EPS)).reshape(B, C, H, W)
        return xn * gamma[None, :, None, None] + beta[None, :, None, None]

    h = conv(x, p['w1'], p['b1'], 1)
    h = gn(h, p['g1'], p['be1'])
    h = h * (scale + 1.0) + shift
    h = jax.nn.silu(h)
    h = conv(h, p['w2'], p['b2'], 1)
    h = gn(h, p['g2'], p['be2'])
    h = jax.nn.silu(h)
    return h + conv(x, p['wr'], p['br'], 0)


if __name__ == "__main__":
    # small shapes implied by the module: dim=4, dim_out=16, groups=8, time_emb_dim=32
    B, Cin, Cout, H, W, T = 2, 4, 16, 16, 16, 32
    key = jax.random.PRNGKey(0)
    ks = jax.random.split(key, 16)
    rnd = lambda k, shape, s=0.1: jax.random.normal(k, shape, jnp.float32) * s

    params = dict(
        mlp_w=rnd(ks[0], (2 * Cout, T)), mlp_b=rnd(ks[1], (2 * Cout,)),
        w1=rnd(ks[2], (Cout, Cin, 3, 3)), b1=rnd(ks[3], (Cout,)),
        g1=1.0 + rnd(ks[4], (Cout,)), be1=rnd(ks[5], (Cout,)),
        w2=rnd(ks[6], (Cout, Cout, 3, 3)), b2=rnd(ks[7], (Cout,)),
        g2=1.0 + rnd(ks[8], (Cout,)), be2=rnd(ks[9], (Cout,)),
        wr=rnd(ks[10], (Cout, Cin, 1, 1)), br=rnd(ks[11], (Cout,)),
    )
    x = jax.random.normal(ks[12], (B, Cin, H, W), jnp.float32)
    t_emb = jax.random.normal(ks[13], (B, T), jnp.float32)

    out = resnet_block_forward(x, t_emb, params)
    out = jax.block_until_ready(out)

    ref = reference_forward(x, t_emb, params)
    assert out.shape == (B, Cout, H, W), out.shape
    assert jnp.allclose(out, ref, atol=2e-3, rtol=2e-3), \
        float(jnp.max(jnp.abs(out - ref)))
    print("KERNEL_OK")
</pallas_src>

<mosaic_0001>
module attributes {stable_mosaic.version = 11 : i64} {
  func.func @_resnet_block_kernel(%arg0: i32, %arg1: memref<8x256xf32, #tpu.memory_space<vmem>>, %arg2: memref<32x2xf32, #tpu.memory_space<vmem>>, %arg3: memref<16x72xf32, #tpu.memory_space<vmem>>, %arg4: memref<16x144xf32, #tpu.memory_space<vmem>>, %arg5: memref<16x8xf32, #tpu.memory_space<vmem>>, %arg6: memref<16x7xf32, #tpu.memory_space<vmem>>, %arg7: memref<32x32xf32, #tpu.memory_space<vmem>>, %arg8: memref<9x16x256xf32, #tpu.memory_space<vmem>>, %arg9: memref<16x256xf32, #tpu.memory_space<vmem>>, %arg10: memref<144x256xf32, #tpu.memory_space<vmem>>) attributes {dimension_semantics = [#tpu.dimension_semantics<parallel>], iteration_bounds = array<i64: 2>, scalar_prefetch = 0 : i64, scratch_operands = 1 : i64, tpu.core_type = #tpu.core_type<tc>, window_params = [{transform_indices = @transform_0, window_bounds = array<i64: 8, 256>}, {pipeline_mode = #tpu.pipeline_mode<synchronous>, transform_indices = @transform_1, window_bounds = array<i64: 32, 2>}, {pipeline_mode = #tpu.pipeline_mode<synchronous>, transform_indices = @transform_2, window_bounds = array<i64: 16, 72>}, {pipeline_mode = #tpu.pipeline_mode<synchronous>, transform_indices = @transform_3, window_bounds = array<i64: 16, 144>}, {pipeline_mode = #tpu.pipeline_mode<synchronous>, transform_indices = @transform_4, window_bounds = array<i64: 16, 8>}, {pipeline_mode = #tpu.pipeline_mode<synchronous>, transform_indices = @transform_5, window_bounds = array<i64: 16, 7>}, {pipeline_mode = #tpu.pipeline_mode<synchronous>, transform_indices = @transform_6, window_bounds = array<i64: 32, 32>}, {pipeline_mode = #tpu.pipeline_mode<synchronous>, transform_indices = @transform_7, window_bounds = array<i64: 9, 16, 256>}, {transform_indices = @transform_8, window_bounds = array<i64: 16, 256>}]} {
    %c0 = arith.constant 0 : index
    %c0_0 = arith.constant 0 : index
    %0 = vector.load %arg6[%c0, %c0_0] : memref<16x7xf32, #tpu.memory_space<vmem>>, vector<16x7xf32>
    %1 = vector.extract_strided_slice %0 {offsets = [0, 0], sizes = [16, 1], strides = [1, 1]} : vector<16x7xf32> to vector<16x1xf32>
    %2 = vector.extract_strided_slice %0 {offsets = [0, 1], sizes = [16, 1], strides = [1, 1]} : vector<16x7xf32> to vector<16x1xf32>
    %3 = vector.extract_strided_slice %0 {offsets = [0, 2], sizes = [16, 1], strides = [1, 1]} : vector<16x7xf32> to vector<16x1xf32>
    %4 = vector.extract_strided_slice %0 {offsets = [0, 3], sizes = [16, 1], strides = [1, 1]} : vector<16x7xf32> to vector<16x1xf32>
    %5 = vector.extract_strided_slice %0 {offsets = [0, 4], sizes = [16, 1], strides = [1, 1]} : vector<16x7xf32> to vector<16x1xf32>
    %6 = vector.extract_strided_slice %0 {offsets = [0, 5], sizes = [16, 1], strides = [1, 1]} : vector<16x7xf32> to vector<16x1xf32>
    %7 = vector.extract_strided_slice %0 {offsets = [0, 6], sizes = [16, 1], strides = [1, 1]} : vector<16x7xf32> to vector<16x1xf32>
    %c0_1 = arith.constant 0 : index
    %c0_2 = arith.constant 0 : index
    %8 = vector.load %arg2[%c0_1, %c0_2] : memref<32x2xf32, #tpu.memory_space<vmem>>, vector<32x2xf32>
    %9 = tpu.iota {dimensions = array<i32: 1>} : vector<1x2xi32>
    %10 = vector.broadcast %arg0 : i32 to vector<1x2xi32>
    %11 = arith.cmpi eq, %9, %10 : vector<1x2xi32>
    %cst = arith.constant 0.000000e+00 : f32
    %12 = vector.shape_cast %11 : vector<1x2xi1> to vector<1x2xi1>
    %13 = vector.broadcast %12 : vector<1x2xi1> to vector<32x2xi1>
    %14 = vector.broadcast %cst : f32 to vector<32x2xf32>
    %15 = arith.select %13, %8, %14 : vector<32x2xi1>, vector<32x2xf32>
    %cst_3 = arith.constant dense<0.000000e+00> : vector<32xf32>
    %16 = vector.multi_reduction <add>, %15, %cst_3 [1] : vector<32x2xf32> to vector<32xf32>
    %17 = vector.shape_cast %16 : vector<32xf32> to vector<32x1xf32>
    %18 = vector.extract_strided_slice %17 {offsets = [0, 0], sizes = [16, 1], strides = [1, 1]} : vector<32x1xf32> to vector<16x1xf32>
    %19 = vector.extract_strided_slice %17 {offsets = [16, 0], sizes = [16, 1], strides = [1, 1]} : vector<32x1xf32> to vector<16x1xf32>
    %c0_4 = arith.constant 0 : index
    %c0_5 = arith.constant 0 : index
    %20 = vector.load %arg1[%c0_4, %c0_5] : memref<8x256xf32, #tpu.memory_space<vmem>>, vector<8x256xf32>
    %c17_i32 = arith.constant 17 : i32
    %21 = tpu.dynamic_rotate %20 by %c17_i32 dim 1 : vector<8x256xf32>, i32 -> vector<8x256xf32>
    %c0_6 = arith.constant 0 : index
    %c0_7 = arith.constant 0 : index
    %c0_8 = arith.constant 0 : index
    %22 = vector.load %arg8[%c0_6, %c0_7, %c0_8] : memref<9x16x256xf32, #tpu.memory_space<vmem>>, vector<1x16x256xf32>
    %23 = vector.shape_cast %22 : vector<1x16x256xf32> to vector<16x256xf32>
    %24 = vector.extract_strided_slice %23 {offsets = [0, 0], sizes = [8, 256], strides = [1, 1]} : vector<16x256xf32> to vector<8x256xf32>
    %25 = arith.mulf %21, %24 : vector<8x256xf32>
    %c0_9 = arith.constant 0 : index
    %c0_10 = arith.constant 0 : index
    %26 = vector.load %arg10[%c0_9, %c0_10] : memref<144x256xf32, #tpu.memory_space<vmem>>, vector<8x256xf32>
    tpu.vector_store %arg10[%c0_9, %c0_10], %25 {strides = array<i32>} : memref<144x256xf32, #tpu.memory_space<vmem>>, vector<8x256xf32>,
    %c16_i32 = arith.constant 16 : i32
    %27 = tpu.dynamic_rotate %20 by %c16_i32 dim 1 : vector<8x256xf32>, i32 -> vector<8x256xf32>
    %c1 = arith.constant 1 : index
    %c0_11 = arith.constant 0 : index
    %c0_12 = arith.constant 0 : index
    %28 = vector.load %arg8[%c1, %c0_11, %c0_12] : memref<9x16x256xf32, #tpu.memory_space<vmem>>, vector<1x16x256xf32>
    %29 = vector.shape_cast %28 : vector<1x16x256xf32> to vector<16x256xf32>
    %30 = vector.extract_strided_slice %29 {offsets = [0, 0], sizes = [8, 256], strides = [1, 1]} : vector<16x256xf32> to vector<8x256xf32>
    %31 = arith.mulf %27, %30 : vector<8x256xf32>
    %c8 = arith.constant 8 : index
    %c0_13 = arith.constant 0 : index
    %32 = vector.load %arg10[%c8, %c0_13] : memref<144x256xf32, #tpu.memory_space<vmem>>, vector<8x256xf32>
    tpu.vector_store %arg10[%c8, %c0_13], %31 {strides = array<i32>} : memref<144x256xf32, #tpu.memory_space<vmem>>, vector<8x256xf32>,
    %c15_i32 = arith.constant 15 : i32
    %33 = tpu.dynamic_rotate %20 by %c15_i32 dim 1 : vector<8x256xf32>, i32 -> vector<8x256xf32>
    %c2 = arith.constant 2 : index
    %c0_14 = arith.constant 0 : index
    %c0_15 = arith.constant 0 : index
    %34 = vector.load %arg8[%c2, %c0_14, %c0_15] : memref<9x16x256xf32, #tpu.memory_space<vmem>>, vector<1x16x256xf32>
    %35 = vector.shape_cast %34 : vector<1x16x256xf32> to vector<16x256xf32>
    %36 = vector.extract_strided_slice %35 {offsets = [0, 0], sizes = [8, 256], strides = [1, 1]} : vector<16x256xf32> to vector<8x256xf32>
    %37 = arith.mulf %33, %36 : vector<8x256xf32>
    %c16 = arith.constant 16 : index
    %c0_16 = arith.constant 0 : index
    %38 = vector.load %arg10[%c16, %c0_16] : memref<144x256xf32, #tpu.memory_space<vmem>>, vector<8x256xf32>
    tpu.vector_store %arg10[%c16, %c0_16], %37 {strides = array<i32>} : memref<144x256xf32, #tpu.memory_space<vmem>>, vector<8x256xf32>,
    %c1_i32 = arith.constant 1 : i32
    %39 = tpu.dynamic_rotate %20 by %c1_i32 dim 1 : vector<8x256xf32>, i32 -> vector<8x256xf32>
    %c3 = arith.constant 3 : index
    %c0_17 = arith.constant 0 : index
    %c0_18 = arith.constant 0 : index
    %40 = vector.load %arg8[%c3, %c0_17, %c0_18] : memref<9x16x256xf32, #tpu.memory_space<vmem>>, vector<1x16x256xf32>
    %41 = vector.shape_cast %40 : vector<1x16x256xf32> to vector<16x256xf32>
    %42 = vector.extract_strided_slice %41 {offsets = [0, 0], sizes = [8, 256], strides = [1, 1]} : vector<16x256xf32> to vector<8x256xf32>
    %43 = arith.mulf %39, %42 : vector<8x256xf32>
    %c24 = arith.constant 24 : index
    %c0_19 = arith.constant 0 : index
    %44 = vector.load %arg10[%c24, %c0_19] : memref<144x256xf32, #tpu.memory_space<vmem>>, vector<8x256xf32>
    tpu.vector_store %arg10[%c24, %c0_19], %43 {strides = array<i32>} : memref<144x256xf32, #tpu.memory_space<vmem>>, vector<8x256xf32>,
    %c32 = arith.constant 32 : index
    %c0_20 = arith.constant 0 : index
    %45 = vector.load %arg10[%c32, %c0_20] : memref<144x256xf32, #tpu.memory_space<vmem>>, vector<8x256xf32>
    tpu.vector_store %arg10[%c32, %c0_20], %20 {strides = array<i32>} : memref<144x256xf32, #tpu.memory_space<vmem>>, vector<8x256xf32>,
    %c255_i32 = arith.constant 255 : i32
    %46 = tpu.dynamic_rotate %20 by %c255_i32 dim 1 : vector<8x256xf32>, i32 -> vector<8x256xf32>
    %c5 = arith.constant 5 : index
    %c0_21 = arith.constant 0 : index
    %c0_22 = arith.constant 0 : index
    %47 = vector.load %arg8[%c5, %c0_21, %c0_22] : memref<9x16x256xf32, #tpu.memory_space<vmem>>, vector<1x16x256xf32>
    %48 = vector.shape_cast %47 : vector<1x16x256xf32> to vector<16x256xf32>
    %49 = vector.extract_strided_slice %48 {offsets = [0, 0], sizes = [8, 256], strides = [1, 1]} : vector<16x256xf32> to vector<8x256xf32>
    %50 = arith.mulf %46, %49 : vector<8x256xf32>
    %c40 = arith.constant 40 : index
    %c0_23 = arith.constant 0 : index
    %51 = vector.load %arg10[%c40, %c0_23] : memref<144x256xf32, #tpu.memory_space<vmem>>, vector<8x256xf32>
    tpu.vector_store %arg10[%c40, %c0_23], %50 {strides = array<i32>} : memref<144x256xf32, #tpu.memory_space<vmem>>, vector<8x256xf32>,
    %c241_i32 = arith.constant 241 : i32
    %52 = tpu.dynamic_rotate %20 by %c241_i32 dim 1 : vector<8x256xf32>, i32 -> vector<8x256xf32>
    %c6 = arith.constant 6 : index
    %c0_24 = arith.constant 0 : index
    %c0_25 = arith.constant 0 : index
    %53 = vector.load %arg8[%c6, %c0_24, %c0_25] : memref<9x16x256xf32, #tpu.memory_space<vmem>>, vector<1x16x256xf32>
    %54 = vector.shape_cast %53 : vector<1x16x256xf32> to vector<16x256xf32>
    %55 = vector.extract_strided_slice %54 {offsets = [0, 0], sizes = [8, 256], strides = [1, 1]} : vector<16x256xf32> to vector<8x256xf32>
    %56 = arith.mulf %52, %55 : vector<8x256xf32>
    %c48 = arith.constant 48 : index
    %c0_26 = arith.constant 0 : index
    %57 = vector.load %arg10[%c48, %c0_26] : memref<144x256xf32, #tpu.memory_space<vmem>>, vector<8x256xf32>
    tpu.vector_store %arg10[%c48, %c0_26], %56 {strides = array<i32>} : memref<144x256xf32, #tpu.memory_space<vmem>>, vector<8x256xf32>,
    %c240_i32 = arith.constant 240 : i32
    %58 = tpu.dynamic_rotate %20 by %c240_i32 dim 1 : vector<8x256xf32>, i32 -> vector<8x256xf32>
    %c7 = arith.constant 7 : index
    %c0_27 = arith.constant 0 : index
    %c0_28 = arith.constant 0 : index
    %59 = vector.load %arg8[%c7, %c0_27, %c0_28] : memref<9x16x256xf32, #tpu.memory_space<vmem>>, vector<1x16x256xf32>
    %60 = vector.shape_cast %59 : vector<1x16x256xf32> to vector<16x256xf32>
    %61 = vector.extract_strided_slice %60 {offsets = [0, 0], sizes = [8, 256], strides = [1, 1]} : vector<16x256xf32> to vector<8x256xf32>
    %62 = arith.mulf %58, %61 : vector<8x256xf32>
    %c56 = arith.constant 56 : index
    %c0_29 = arith.constant 0 : index
    %63 = vector.load %arg10[%c56, %c0_29] : memref<144x256xf32, #tpu.memory_space<vmem>>, vector<8x256xf32>
    tpu.vector_store %arg10[%c56, %c0_29], %62 {strides = array<i32>} : memref<144x256xf32, #tpu.memory_space<vmem>>, vector<8x256xf32>,
    %c239_i32 = arith.constant 239 : i32
    %64 = tpu.dynamic_rotate %20 by %c239_i32 dim 1 : vector<8x256xf32>, i32 -> vector<8x256xf32>
    %c8_30 = arith.constant 8 : index
    %c0_31 = arith.constant 0 : index
    %c0_32 = arith.constant 0 : index
    %65 = vector.load %arg8[%c8_30, %c0_31, %c0_32] : memref<9x16x256xf32, #tpu.memory_space<vmem>>, vector<1x16x256xf32>
    %66 = vector.shape_cast %65 : vector<1x16x256xf32> to vector<16x256xf32>
    %67 = vector.extract_strided_slice %66 {offsets = [0, 0], sizes = [8, 256], strides = [1, 1]} : vector<16x256xf32> to vector<8x256xf32>
    %68 = arith.mulf %64, %67 : vector<8x256xf32>
    %c64 = arith.constant 64 : index
    %c0_33 = arith.constant 0 : index
    %69 = vector.load %arg10[%c64, %c0_33] : memref<144x256xf32, #tpu.memory_space<vmem>>, vector<8x256xf32>
    tpu.vector_store %arg10[%c64, %c0_33], %68 {strides = array<i32>} : memref<144x256xf32, #tpu.memory_space<vmem>>, vector<8x256xf32>,
    %c0_34 = arith.constant 0 : index
    %c0_35 = arith.constant 0 : index
    %70 = vector.load %arg3[%c0_34, %c0_35] : memref<16x72xf32, #tpu.memory_space<vmem>>, vector<16x72xf32>
    %c0_36 = arith.constant 0 : index
    %c0_37 = arith.constant 0 : index
    %71 = vector.load %arg10[%c0_36, %c0_37] : memref<144x256xf32, #tpu.memory_space<vmem>>, vector<72x256xf32>
    %cst_38 = arith.constant dense<0.000000e+00> : vector<16x256xf32>
    %72 = tpu.matmul %70, %71, %cst_38 {dimension_numbers = #tpu.dot_dimension_numbers<[1], [0], [0], [1], [0, 0, 1, 1], [], []>} : vector<16x72xf32>, vector<72x256xf32>, vector<16x256xf32> -> vector<16x256xf32>
    %73 = vector.broadcast %1 : vector<16x1xf32> to vector<16x256xf32>
    %74 = arith.addf %72, %73 : vector<16x256xf32>
    %cst_39 = arith.constant dense<0.000000e+00> : vector<16xf32>
    %75 = vector.multi_reduction <add>, %74, %cst_39 [1] : vector<16x256xf32> to vector<16xf32>
    %76 = vector.shape_cast %75 : vector<16xf32> to vector<16x1xf32>
    %77 = arith.mulf %74, %74 : vector<16x256xf32>
    %cst_40 = arith.constant dense<0.000000e+00> : vector<16xf32>
    %78 = vector.multi_reduction <add>, %77, %cst_40 [1] : vector<16x256xf32> to vector<16xf32>
    %79 = vector.shape_cast %78 : vector<16xf32> to vector<16x1xf32>
    %c0_41 = arith.constant 0 : index
    %c0_42 = arith.constant 0 : index
    %80 = vector.load %arg7[%c0_41, %c0_42] : memref<32x32xf32, #tpu.memory_space<vmem>>, vector<32x32xf32>
    %81 = tpu.concatenate %76, %79 in 0 : vector<16x1xf32>, vector<16x1xf32> -> vector<32x1xf32>
    %cst_43 = arith.constant dense<0.000000e+00> : vector<32x1xf32>
    %82 = tpu.matmul %80, %81, %cst_43 {dimension_numbers = #tpu.dot_dimension_numbers<[1], [0], [0], [1], [0, 0, 1, 1], [], []>} : vector<32x32xf32>, vector<32x1xf32>, vector<32x1xf32> -> vector<32x1xf32>
    %83 = vector.extract_strided_slice %82 {offsets = [0, 0], sizes = [16, 1], strides = [1, 1]} : vector<32x1xf32> to vector<16x1xf32>
    %84 = vector.extract_strided_slice %82 {offsets = [16, 0], sizes = [16, 1], strides = [1, 1]} : vector<32x1xf32> to vector<16x1xf32>
    %85 = arith.mulf %83, %83 : vector<16x1xf32>
    %86 = arith.subf %84, %85 : vector<16x1xf32>
    %cst_44 = arith.constant 9.99999974E-6 : f32
    %87 = vector.broadcast %cst_44 : f32 to vector<16x1xf32>
    %88 = arith.addf %86, %87 : vector<16x1xf32>
    %89 = math.rsqrt %88 : vector<16x1xf32>
    %90 = arith.mulf %89, %2 : vector<16x1xf32>
    %91 = arith.mulf %83, %90 : vector<16x1xf32>
    %92 = arith.subf %3, %91 : vector<16x1xf32>
    %cst_45 = arith.constant 1.000000e+00 : f32
    %93 = vector.broadcast %cst_45 : f32 to vector<16x1xf32>
    %94 = arith.addf %93, %18 : vector<16x1xf32>
    %95 = arith.mulf %90, %94 : vector<16x1xf32>
    %cst_46 = arith.constant 1.000000e+00 : f32
    %96 = vector.broadcast %cst_46 : f32 to vector<16x1xf32>
    %97 = arith.addf %96, %18 : vector<16x1xf32>
    %98 = arith.mulf %92, %97 : vector<16x1xf32>
    %99 = arith.addf %98, %19 : vector<16x1xf32>
    %100 = vector.broadcast %95 : vector<16x1xf32> to vector<16x256xf32>
    %101 = arith.mulf %74, %100 : vector<16x256xf32>
    %102 = vector.broadcast %99 : vector<16x1xf32> to vector<16x256xf32>
    %103 = arith.addf %101, %102 : vector<16x256xf32>
    %cst_47 = arith.constant 5.000000e-01 : f32
    %104 = vector.broadcast %cst_47 : f32 to vector<16x256xf32>
    %105 = arith.mulf %104, %103 : vector<16x256xf32>
    %106 = math.tanh %105 : vector<16x256xf32>
    %cst_48 = arith.constant 1.000000e+00 : f32
    %107 = vector.broadcast %cst_48 : f32 to vector<16x256xf32>
    %108 = arith.addf %106, %107 : vector<16x256xf32>
    %cst_49 = arith.constant 5.000000e-01 : f32
    %109 = vector.broadcast %cst_49 : f32 to vector<16x256xf32>
    %110 = arith.mulf %109, %108 : vector<16x256xf32>
    %111 = arith.mulf %103, %110 : vector<16x256xf32>
    %c17_i32_50 = arith.constant 17 : i32
    %112 = tpu.dynamic_rotate %111 by %c17_i32_50 dim 1 : vector<16x256xf32>, i32 -> vector<16x256xf32>
    %c0_51 = arith.constant 0 : index
    %c0_52 = arith.constant 0 : index
    %c0_53 = arith.constant 0 : index
    %113 = vector.load %arg8[%c0_51, %c0_52, %c0_53] : memref<9x16x256xf32, #tpu.memory_space<vmem>>, vector<1x16x256xf32>
    %114 = vector.shape_cast %113 : vector<1x16x256xf32> to vector<16x256xf32>
    %115 = arith.mulf %112, %114 : vector<16x256xf32>
    %c0_54 = arith.constant 0 : index
    %c0_55 = arith.constant 0 : index
    %116 = vector.load %arg10[%c0_54, %c0_55] : memref<144x256xf32, #tpu.memory_space<vmem>>, vector<16x256xf32>
    tpu.vector_store %arg10[%c0_54, %c0_55], %115 {strides = array<i32>} : memref<144x256xf32, #tpu.memory_space<vmem>>, vector<16x256xf32>,
    %c16_i32_56 = arith.constant 16 : i32
    %117 = tpu.dynamic_rotate %111 by %c16_i32_56 dim 1 : vector<16x256xf32>, i32 -> vector<16x256xf32>
    %c1_57 = arith.constant 1 : index
    %c0_58 = arith.constant 0 : index
    %c0_59 = arith.constant 0 : index
    %118 = vector.load %arg8[%c1_57, %c0_58, %c0_59] : memref<9x16x256xf32, #tpu.memory_space<vmem>>, vector<1x16x256xf32>
    %119 = vector.shape_cast %118 : vector<1x16x256xf32> to vector<16x256xf32>
    %120 = arith.mulf %117, %119 : vector<16x256xf32>
    %c16_60 = arith.constant 16 : index
    %c0_61 = arith.constant 0 : index
    %121 = vector.load %arg10[%c16_60, %c0_61] : memref<144x256xf32, #tpu.memory_space<vmem>>, vector<16x256xf32>
    tpu.vector_store %arg10[%c16_60, %c0_61], %120 {strides = array<i32>} : memref<144x256xf32, #tpu.memory_space<vmem>>, vector<16x256xf32>,
    %c15_i32_62 = arith.constant 15 : i32
    %122 = tpu.dynamic_rotate %111 by %c15_i32_62 dim 1 : vector<16x256xf32>, i32 -> vector<16x256xf32>
    %c2_63 = arith.constant 2 : index
    %c0_64 = arith.constant 0 : index
    %c0_65 = arith.constant 0 : index
    %123 = vector.load %arg8[%c2_63, %c0_64, %c0_65] : memref<9x16x256xf32, #tpu.memory_space<vmem>>, vector<1x16x256xf32>
    %124 = vector.shape_cast %123 : vector<1x16x256xf32> to vector<16x256xf32>
    %125 = arith.mulf %122, %124 : vector<16x256xf32>
    %c32_66 = arith.constant 32 : index
    %c0_67 = arith.constant 0 : index
    %126 = vector.load %arg10[%c32_66, %c0_67] : memref<144x256xf32, #tpu.memory_space<vmem>>, vector<16x256xf32>
    tpu.vector_store %arg10[%c32_66, %c0_67], %125 {strides = array<i32>} : memref<144x256xf32, #tpu.memory_space<vmem>>, vector<16x256xf32>,
    %c1_i32_68 = arith.constant 1 : i32
    %127 = tpu.dynamic_rotate %111 by %c1_i32_68 dim 1 : vector<16x256xf32>, i32 -> vector<16x256xf32>
    %c3_69 = arith.constant 3 : index
    %c0_70 = arith.constant 0 : index
    %c0_71 = arith.constant 0 : index
    %128 = vector.load %arg8[%c3_69, %c0_70, %c0_71] : memref<9x16x256xf32, #tpu.memory_space<vmem>>, vector<1x16x256xf32>
    %129 = vector.shape_cast %128 : vector<1x16x256xf32> to vector<16x256xf32>
    %130 = arith.mulf %127, %129 : vector<16x256xf32>
    %c48_72 = arith.constant 48 : index
    %c0_73 = arith.constant 0 : index
    %131 = vector.load %arg10[%c48_72, %c0_73] : memref<144x256xf32, #tpu.memory_space<vmem>>, vector<16x256xf32>
    tpu.vector_store %arg10[%c48_72, %c0_73], %130 {strides = array<i32>} : memref<144x256xf32, #tpu.memory_space<vmem>>, vector<16x256xf32>,
    %c64_74 = arith.constant 64 : index
    %c0_75 = arith.constant 0 : index
    %132 = vector.load %arg10[%c64_74, %c0_75] : memref<144x256xf32, #tpu.memory_space<vmem>>, vector<16x256xf32>
    tpu.vector_store %arg10[%c64_74, %c0_75], %111 {strides = array<i32>} : memref<144x256xf32, #tpu.memory_space<vmem>>, vector<16x256xf32>,
    %c255_i32_76 = arith.constant 255 : i32
    %133 = tpu.dynamic_rotate %111 by %c255_i32_76 dim 1 : vector<16x256xf32>, i32 -> vector<16x256xf32>
    %c5_77 = arith.constant 5 : index
    %c0_78 = arith.constant 0 : index
    %c0_79 = arith.constant 0 : index
    %134 = vector.load %arg8[%c5_77, %c0_78, %c0_79] : memref<9x16x256xf32, #tpu.memory_space<vmem>>, vector<1x16x256xf32>
    %135 = vector.shape_cast %134 : vector<1x16x256xf32> to vector<16x256xf32>
    %136 = arith.mulf %133, %135 : vector<16x256xf32>
    %c80 = arith.constant 80 : index
    %c0_80 = arith.constant 0 : index
    %137 = vector.load %arg10[%c80, %c0_80] : memref<144x256xf32, #tpu.memory_space<vmem>>, vector<16x256xf32>
    tpu.vector_store %arg10[%c80, %c0_80], %136 {strides = array<i32>} : memref<144x256xf32, #tpu.memory_space<vmem>>, vector<16x256xf32>,
    %c241_i32_81 = arith.constant 241 : i32
    %138 = tpu.dynamic_rotate %111 by %c241_i32_81 dim 1 : vector<16x256xf32>, i32 -> vector<16x256xf32>
    %c6_82 = arith.constant 6 : index
    %c0_83 = arith.constant 0 : index
    %c0_84 = arith.constant 0 : index
    %139 = vector.load %arg8[%c6_82, %c0_83, %c0_84] : memref<9x16x256xf32, #tpu.memory_space<vmem>>, vector<1x16x256xf32>
    %140 = vector.shape_cast %139 : vector<1x16x256xf32> to vector<16x256xf32>
    %141 = arith.mulf %138, %140 : vector<16x256xf32>
    %c96 = arith.constant 96 : index
    %c0_85 = arith.constant 0 : index
    %142 = vector.load %arg10[%c96, %c0_85] : memref<144x256xf32, #tpu.memory_space<vmem>>, vector<16x256xf32>
    tpu.vector_store %arg10[%c96, %c0_85], %141 {strides = array<i32>} : memref<144x256xf32, #tpu.memory_space<vmem>>, vector<16x256xf32>,
    %c240_i32_86 = arith.constant 240 : i32
    %143 = tpu.dynamic_rotate %111 by %c240_i32_86 dim 1 : vector<16x256xf32>, i32 -> vector<16x256xf32>
    %c7_87 = arith.constant 7 : index
    %c0_88 = arith.constant 0 : index
    %c0_89 = arith.constant 0 : index
    %144 = vector.load %arg8[%c7_87, %c0_88, %c0_89] : memref<9x16x256xf32, #tpu.memory_space<vmem>>, vector<1x16x256xf32>
    %145 = vector.shape_cast %144 : vector<1x16x256xf32> to vector<16x256xf32>
    %146 = arith.mulf %143, %145 : vector<16x256xf32>
    %c112 = arith.constant 112 : index
    %c0_90 = arith.constant 0 : index
    %147 = vector.load %arg10[%c112, %c0_90] : memref<144x256xf32, #tpu.memory_space<vmem>>, vector<16x256xf32>
    tpu.vector_store %arg10[%c112, %c0_90], %146 {strides = array<i32>} : memref<144x256xf32, #tpu.memory_space<vmem>>, vector<16x256xf32>,
    %c239_i32_91 = arith.constant 239 : i32
    %148 = tpu.dynamic_rotate %111 by %c239_i32_91 dim 1 : vector<16x256xf32>, i32 -> vector<16x256xf32>
    %c8_92 = arith.constant 8 : index
    %c0_93 = arith.constant 0 : index
    %c0_94 = arith.constant 0 : index
    %149 = vector.load %arg8[%c8_92, %c0_93, %c0_94] : memref<9x16x256xf32, #tpu.memory_space<vmem>>, vector<1x16x256xf32>
    %150 = vector.shape_cast %149 : vector<1x16x256xf32> to vector<16x256xf32>
    %151 = arith.mulf %148, %150 : vector<16x256xf32>
    %c128 = arith.constant 128 : index
    %c0_95 = arith.constant 0 : index
    %152 = vector.load %arg10[%c128, %c0_95] : memref<144x256xf32, #tpu.memory_space<vmem>>, vector<16x256xf32>
    tpu.vector_store %arg10[%c128, %c0_95], %151 {strides = array<i32>} : memref<144x256xf32, #tpu.memory_space<vmem>>, vector<16x256xf32>,
    %c0_96 = arith.constant 0 : index
    %c0_97 = arith.constant 0 : index
    %153 = vector.load %arg4[%c0_96, %c0_97] : memref<16x144xf32, #tpu.memory_space<vmem>>, vector<16x144xf32>
    %c0_98 = arith.constant 0 : index
    %c0_99 = arith.constant 0 : index
    %154 = vector.load %arg10[%c0_98, %c0_99] : memref<144x256xf32, #tpu.memory_space<vmem>>, vector<144x256xf32>
    %cst_100 = arith.constant dense<0.000000e+00> : vector<16x256xf32>
    %155 = tpu.matmul %153, %154, %cst_100 {dimension_numbers = #tpu.dot_dimension_numbers<[1], [0], [0], [1], [0, 0, 1, 1], [], []>} : vector<16x144xf32>, vector<144x256xf32>, vector<16x256xf32> -> vector<16x256xf32>
    %156 = vector.broadcast %4 : vector<16x1xf32> to vector<16x256xf32>
    %157 = arith.addf %155, %156 : vector<16x256xf32>
    %cst_101 = arith.constant dense<0.000000e+00> : vector<16xf32>
    %158 = vector.multi_reduction <add>, %157, %cst_101 [1] : vector<16x256xf32> to vector<16xf32>
    %159 = vector.shape_cast %158 : vector<16xf32> to vector<16x1xf32>
    %160 = arith.mulf %157, %157 : vector<16x256xf32>
    %cst_102 = arith.constant dense<0.000000e+00> : vector<16xf32>
    %161 = vector.multi_reduction <add>, %160, %cst_102 [1] : vector<16x256xf32> to vector<16xf32>
    %162 = vector.shape_cast %161 : vector<16xf32> to vector<16x1xf32>
    %c0_103 = arith.constant 0 : index
    %c0_104 = arith.constant 0 : index
    %163 = vector.load %arg7[%c0_103, %c0_104] : memref<32x32xf32, #tpu.memory_space<vmem>>, vector<32x32xf32>
    %164 = tpu.concatenate %159, %162 in 0 : vector<16x1xf32>, vector<16x1xf32> -> vector<32x1xf32>
    %cst_105 = arith.constant dense<0.000000e+00> : vector<32x1xf32>
    %165 = tpu.matmul %163, %164, %cst_105 {dimension_numbers = #tpu.dot_dimension_numbers<[1], [0], [0], [1], [0, 0, 1, 1], [], []>} : vector<32x32xf32>, vector<32x1xf32>, vector<32x1xf32> -> vector<32x1xf32>
    %166 = vector.extract_strided_slice %165 {offsets = [0, 0], sizes = [16, 1], strides = [1, 1]} : vector<32x1xf32> to vector<16x1xf32>
    %167 = vector.extract_strided_slice %165 {offsets = [16, 0], sizes = [16, 1], strides = [1, 1]} : vector<32x1xf32> to vector<16x1xf32>
    %168 = arith.mulf %166, %166 : vector<16x1xf32>
    %169 = arith.subf %167, %168 : vector<16x1xf32>
    %cst_106 = arith.constant 9.99999974E-6 : f32
    %170 = vector.broadcast %cst_106 : f32 to vector<16x1xf32>
    %171 = arith.addf %169, %170 : vector<16x1xf32>
    %172 = math.rsqrt %171 : vector<16x1xf32>
    %173 = arith.mulf %172, %5 : vector<16x1xf32>
    %174 = arith.mulf %166, %173 : vector<16x1xf32>
    %175 = arith.subf %6, %174 : vector<16x1xf32>
    %176 = vector.broadcast %173 : vector<16x1xf32> to vector<16x256xf32>
    %177 = arith.mulf %157, %176 : vector<16x256xf32>
    %178 = vector.broadcast %175 : vector<16x1xf32> to vector<16x256xf32>
    %179 = arith.addf %177, %178 : vector<16x256xf32>
    %cst_107 = arith.constant 5.000000e-01 : f32
    %180 = vector.broadcast %cst_107 : f32 to vector<16x256xf32>
    %181 = arith.mulf %180, %179 : vector<16x256xf32>
    %182 = math.tanh %181 : vector<16x256xf32>
    %cst_108 = arith.constant 1.000000e+00 : f32
    %183 = vector.broadcast %cst_108 : f32 to vector<16x256xf32>
    %184 = arith.addf %182, %183 : vector<16x256xf32>
    %cst_109 = arith.constant 5.000000e-01 : f32
    %185 = vector.broadcast %cst_109 : f32 to vector<16x256xf32>
    %186 = arith.mulf %185, %184 : vector<16x256xf32>
    %187 = arith.mulf %179, %186 : vector<16x256xf32>
    %c0_110 = arith.constant 0 : index
    %c0_111 = arith.constant 0 : index
    %188 = vector.load %arg5[%c0_110, %c0_111] : memref<16x8xf32, #tpu.memory_space<vmem>>, vector<16x8xf32>
    %cst_112 = arith.constant dense<0.000000e+00> : vector<16x256xf32>
    %189 = tpu.matmul %188, %20, %cst_112 {dimension_numbers = #tpu.dot_dimension_numbers<[1], [0], [0], [1], [0, 0, 1, 1], [], []>} : vector<16x8xf32>, vector<8x256xf32>, vector<16x256xf32> -> vector<16x256xf32>
    %190 = vector.broadcast %7 : vector<16x1xf32> to vector<16x256xf32>
    %191 = arith.addf %189, %190 : vector<16x256xf32>
    %192 = arith.addf %187, %191 : vector<16x256xf32>
    %c0_113 = arith.constant 0 : index
    %c0_114 = arith.constant 0 : index
    %193 = vector.load %arg9[%c0_113, %c0_114] : memref<16x256xf32, #tpu.memory_space<vmem>>, vector<16x256xf32>
    tpu.vector_store %arg9[%c0_113, %c0_114], %192 {strides = array<i32>} : memref<16x256xf32, #tpu.memory_space<vmem>>, vector<16x256xf32>,
    return
  }
  func.func @transform_0(%arg0: i32) -> (i32, i32) {
    %c0_i32 = arith.constant 0 : i32
    %c0_i32_0 = arith.constant 0 : i32
    return %c0_i32, %arg0 : i32, i32
  }
  func.func @transform_1(%arg0: i32) -> (i32, i32) {
    %c0_i32 = arith.constant 0 : i32
    %c0_i32_0 = arith.constant 0 : i32
    %c0_i32_1 = arith.constant 0 : i32
    return %c0_i32, %c0_i32_0 : i32, i32
  }
  func.func @transform_2(%arg0: i32) -> (i32, i32) {
    %c0_i32 = arith.constant 0 : i32
    %c0_i32_0 = arith.constant 0 : i32
    %c0_i32_1 = arith.constant 0 : i32
    return %c0_i32, %c0_i32_0 : i32, i32
  }
  func.func @transform_3(%arg0: i32) -> (i32, i32) {
    %c0_i32 = arith.constant 0 : i32
    %c0_i32_0 = arith.constant 0 : i32
    %c0_i32_1 = arith.constant 0 : i32
    return %c0_i32, %c0_i32_0 : i32, i32
  }
  func.func @transform_4(%arg0: i32) -> (i32, i32) {
    %c0_i32 = arith.constant 0 : i32
    %c0_i32_0 = arith.constant 0 : i32
    %c0_i32_1 = arith.constant 0 : i32
    return %c0_i32, %c0_i32_0 : i32, i32
  }
  func.func @transform_5(%arg0: i32) -> (i32, i32) {
    %c0_i32 = arith.constant 0 : i32
    %c0_i32_0 = arith.constant 0 : i32
    %c0_i32_1 = arith.constant 0 : i32
    return %c0_i32, %c0_i32_0 : i32, i32
  }
  func.func @transform_6(%arg0: i32) -> (i32, i32) {
    %c0_i32 = arith.constant 0 : i32
    %c0_i32_0 = arith.constant 0 : i32
    %c0_i32_1 = arith.constant 0 : i32
    return %c0_i32, %c0_i32_0 : i32, i32
  }
  func.func @transform_7(%arg0: i32) -> (i32, i32, i32) {
    %c0_i32 = arith.constant 0 : i32
    %c0_i32_0 = arith.constant 0 : i32
    %c0_i32_1 = arith.constant 0 : i32
    %c0_i32_2 = arith.constant 0 : i32
    return %c0_i32, %c0_i32_0, %c0_i32_1 : i32, i32, i32
  }
  func.func @transform_8(%arg0: i32) -> (i32, i32) {
    %c0_i32 = arith.constant 0 : i32
    %c0_i32_0 = arith.constant 0 : i32
    return %c0_i32, %arg0 : i32, i32
  }
}

</mosaic_0001>

<bundles_post_ra>
// kernel: tpu_custom_call.1
= control target key start
LH: loop header
LB: loop body
LE: loop exit
PB: predicated region body
PF: predicated region fallthrough
CT: control target
= control target key end

     0   :  { %13 = vsyncpa [#allocation4], 0  ;;  %s2545_s0 = inlined_call_operand.vmem [shape: f32[8,512], index: 0, kind: input, shape index: {}]   ;;  %s2546_s1 = inlined_call_operand.vmem [shape: f32[32,2], index: 1, kind: input, shape index: {}]   ;;  %s2547_s2 = inlined_call_operand.vmem [shape: f32[16,72], index: 2, kind: input, shape index: {}]   ;;  %s2548_s3 = inlined_call_operand.vmem [shape: f32[16,144], index: 3, kind: input, shape index: {}]   ;;  %s2549_s4 = inlined_call_operand.vmem [shape: f32[16,8], index: 4, kind: input, shape index: {}]   ;;  %s2550_s5 = inlined_call_operand.vmem [shape: f32[16,7], index: 5, kind: input, shape index: {}]   ;;  %s2551_s6 = inlined_call_operand.hbm [shape: f32[32,32], index: 6, kind: input, shape index: {}]   ;;  %s2552_s7 = inlined_call_operand.hbm [shape: f32[9,16,256], index: 7, kind: input, shape index: {}]   ;;  %s2553_s8 = inlined_call_operand.hbm [shape: f32[16,512], index: 8, kind: output, shape index: {}]  }
   0x1   :  { %14 = vsyncpa [#allocation7], 0 }
   0x2   :  { %15 = vsyncpa [#allocation5], 0 }
   0x3   :  { %17 = vsyncpa [#allocation5 + $0x1], 0  ;;  %s1916_s27 = smov 0   ;;  %s1918_s28 = smov 0  }
   0x4   :  { %s1920_s29 = smov 0   ;;  %s1922_s30 = smov 0  }
   0x5 LB: > { %s1937_s9 = sadd.s32 4294967295, %s1843_s30   ;;  %s1518_s10 = sadd.s32 4294967294, %s1843_s30   ;;  %s1843_s30 = sphi %s1922_s30, %s2575_s30   ;;  %s1839_s29 = sphi %s1920_s29, %s2574_s29   ;;  %s1835_s28 = sphi %s1918_s28, %s2573_s28   ;;  %s1831_s27 = sphi %s1916_s27, %s2572_s27  }
   0x6   : > { %s1941_s11 = sadd.s32 1, %s1843_s30   ;;  %s203_s12 = sadd.s32 1, %s1839_s29 }
   0x7   : > { %s200_s13 = ssub.s32 %s1843_s30, %s1941_s11  ;;  %p213_p0 = scmp.ne.s32.totalorder %s1839_s29, %s1835_s28 }
   0x8   : > { %p201_p1 = scmp.eq.s32.totalorder %s200_s13, 0  ;;  %p214_p2 = scmp.eq.s32.totalorder %s1937_s9, 1 }
   0x9   : > { %p219_p3 = scmp.ne.s32.totalorder %s1835_s28, %s1831_s27  ;;  %p220_p4 = scmp.eq.s32.totalorder %s1518_s10, 1 }
   0xa   : > { %s1952_s14 = scalar_select %p201_p1, %s1839_s29, %s203_s12  }
   0xb   : > { %p1954_p5 = por %p214_p2, %p213_p0  ;;  %p1958_p6 = por %p220_p4, %p219_p3 }
   0xc   : > { %p1519_p7 = scmp.ge.s32.totalorder %s1843_s30, 1  ;;  %p227_p8 = scmp.lt.s32.totalorder %s1843_s30, 3 }
   0xd   : > { %s2560_s16 = scalar_select %p1958_p6, 1, 0 }
   0xe   : > { %p2554_p9 = scmp.eq.s32.totalorder %s1937_s9, 0  ;;  %p1965_p10 = pnand %p1519_p7, %p227_p8 }
   0xf   : > { %s1845_s18 = smov [#allocation3]   ;;  %s1846_s21 = smov [#allocation6]  }
  0x10   : > { %s254_s19 = sshll.u32 %s1845_s18, 4  ;;  %p1611_p11 = pneg %p1965_p10  ;;  %s255_s19 = int_to_ptr.vmem [resolvable:$true] %s254_s19 }
  0x11   : > { %s267_s22 = sshll.u32 %s1846_s21, 4  ;;  %s1734_s23 = scalar_lea.vmem %s255_s19, 512  ;;  %s268_s22 = int_to_ptr.vmem [resolvable:$true] %s267_s22 }
  0x12   : > { %p1973_p12 = pnand %p2554_p9, %p1611_p11  ;;  %p1735_p0 = scmp.ne.s32.totalorder %s255_s19, %s1734_s23 }
  0x13   : > { %p1742_p3 = scmp.lt.s32.totalorder %s255_s19, %s255_s19  ;;  %p1743_p4 = scmp.lt.s32.totalorder %s1734_s23, %s1734_s23 }
  0x14   : > { %p1725_p13 = pneg %p1973_p12 }
  0x15   : > { %p1744_p7 = por %p1743_p4, %p1742_p3 }
  0x16   : > { %p1737_p1 = pnand %p1735_p0, %p1725_p13 }
  0x18   : > { %p1738_p2 = pneg %p1737_p1 }
  0x1a   : > { %p1745_p8 = pnand %p1744_p7, %p1738_p2 }
  0x1c   : > { %1748 = shalt.err (!%p1745_p8)
}
  0x1d   : > { %s1847_s24 = smov 128   ;;  %s1848_s25 = smov 8  }
  0x1e   : > { %1614 = dma.hbm_to_vmem [thread:$0]  (!%p1973_p12), %s2551_s6, 512, %s255_s19, [#allocation4], %s1847_s24, %s1847_s24, %s1848_s25  }
  0x1f   : > { %s1760_s12 = scalar_lea.vmem %s268_s22, 4608  ;;  %p1768_p9 = scmp.lt.s32.totalorder %s268_s22, %s268_s22 }
  0x20   : > { %p1761_p11 = scmp.ne.s32.totalorder %s268_s22, %s1760_s12  ;;  %p1769_p6 = scmp.lt.s32.totalorder %s1760_s12, %s1760_s12 }
  0x22   : > { %p1763_p0 = pnand %p1761_p11, %p1725_p13  ;;  %p1770_p3 = por %p1769_p6, %p1768_p9 }
  0x24   : > { %p1764_p1 = pneg %p1763_p0 }
  0x26   : > { %p1771_p2 = pnand %p1770_p3, %p1764_p1 }
  0x28   : > { %1774 = shalt.err (!%p1771_p2)
}
  0x29   : > { %s1849_s13 = smov 256   ;;  %s1850_s18 = smov 16  }
  0x2a   : > { %1617 = dma.hbm_to_vmem [thread:$0]  (!%p1973_p12), %s2552_s7, 4608, %s268_s22, [#allocation7], %s1849_s13, %s1849_s13, %s1850_s18  }
  0x2b   : > { %292 = sbr.rel (%p1965_p10) target bundleno = 2086 (0x826), region = 52  ;;  %p2563_p4 = scmp.eq.s32.totalorder (!%p1965_p10), %s1937_s9, 0 }
  0x30   : > { %1818 = dma.done.wait (%p2563_p4), [#allocation4], 512   ;;  %p2564_p13 = pmov %p2563_p4 }
  0x31   : > { %p2565_p6 = pmov %p2563_p4 }
  0x32   : > { %1820 = vsyncadd (%p2564_p13), [#allocation4], 4294966784 }
  0x33   : > { %1822 = dma.done.wait (%p2565_p6), [#allocation7], 4608   ;;  %p2566_p9 = pmov %p2563_p4 }
  0x34   : > { %s1527_s19 = sshll.u32 %s1937_s9, 1  ;;  %s1851_s25 = smov 112   ;;  %v1856_v2 = vmov 0.0   ;;  %v1859_v3 = vmov 0   ;;  %v2055_v4 = vld [vmem:[%s2550_s5] sm:$0xff]  ;;  %v2060_v5 = vld [vmem:[%s2550_s5 + $0x8] sm:$0xff]  ;;  %v343_v6 = vlaneseq }
  0x35   : > { %1824 = vsyncadd (%p2566_p9), [#allocation7], 4294962688  ;;  %p331_p7 = scmp.lt.s32.totalorder %s1527_s19, 3  ;;  %s2555_s26 = smov 111   ;;  %582 = vmatprep.mubr.f32.mxu0 %v1856_v2  ;;  %1685 = vset.pattern.permute.xlu1 %v1859_v3  ;;  %v2068_v10 = vld [vmem:[#allocation6 + $0x108] sm:$0xff]  ;;  %v2070_v11 = vld [vmem:[#allocation6 + $0x100] sm:$0xff] }
  0x36   : > { %s1853_s10 = smov 113   ;;  %s1854_s12 = smov 127   ;;  %1684 = vset.pattern.permute.xlu0 %v1859_v3  ;;  %v2064_v7 = vand.u32 127, %v343_v6  ;;  %v2072_v14 = vld [vmem:[#allocation6 + $0xe8] sm:$0xff]  ;;  %v2080_v18 = vld [vmem:[#allocation6 + $0xe0] sm:$0xff]  ;;  %vm511_vm8 = vcmask 588800  }
  0x37   : > { %s2577_s19 = smov (!%p331_p7, %s1527_s19), 3  ;;  %s1855_s13 = smov 1   ;;  %v2087_v22 = vld [vmem:[#allocation6 + $0xc0] sm:$0xff]  ;;  %v2089_v23 = vld [vmem:[#allocation6 + $0xc8] sm:$0xff]  ;;  %vm615_vm9 = vcmask 261120   ;;  %vm353_vm11 = vcmask 15360  }
  0x38   : > { %s1528_s20 = sshll.u32 %s2577_s19, 3  ;;  %s1857_s18 = smov 15   ;;  %vm457_vm0 = vcmp.lt.s32.totalorder %v2064_v7, 112  ;;  %vm471_vm1 = vcmp.lt.s32.totalorder %v2064_v7, 111  ;;  %vm443_vm2 = vcmp.lt.s32.totalorder %v2064_v7, 113  ;;  %vm429_vm3 = vcmp.lt.s32.totalorder %v2064_v7, 127 }
  0x39   : > { %s2009_s24 = scalar_lea.vmem %s2545_s0, %s1528_s20  ;;  %s1858_s21 = smov 16   ;;  %v2100_v32 = vld [vmem:[#allocation6 + $0xa0] sm:$0xff]  ;;  %v2102_v33 = vld [vmem:[#allocation6 + $0xa8] sm:$0xff]  ;;  %vm413_vm4 = vcmp.lt.s32.totalorder %v2064_v7, 1  ;;  %vm399_vm5 = vcmp.lt.s32.totalorder %v2064_v7, 15  ;;  %vm385_vm6 = vcmp.lt.s32.totalorder %v2064_v7, 16 }
  0x3a   : > { %v2012_v0 = vld [vmem:[%s2009_s24] sm:$0xff]  ;;  %v2019_v1 = vld [vmem:[%s2009_s24 + $0x8] sm:$0xff]  ;;  %s2557_s23 = smov 17   ;;  %vm372_vm7 = vcmp.lt.s32.totalorder %v2064_v7, 17  ;;  %s1861_s19 = smov 2   ;;  %vm1041_vm12 = vcmask 130048  }
  0x3b   : > { %453 = vrot.lane.b32.xlu1 %v2012_v0, %s1851_s25  ;;  %467 = vrot.lane.b32.xlu0 %v2012_v0, %s2555_s26  ;;  %v2111_v40 = vld [vmem:[#allocation6 + $0x60] sm:$0xff]  ;;  %v2113_v41 = vld [vmem:[#allocation6 + $0x68] sm:$0xff]  ;;  %s2569_s20 = smov 17   ;;  %s2570_s22 = smov 111   ;;  %vm1328_vm13 = vcmask 64512  }
  0x3c   : > { %v2124_v48 = vld [vmem:[#allocation6 + $0x40] sm:$0xff]  ;;  %v2126_v49 = vld [vmem:[#allocation6 + $0x48] sm:$0xff] }
  0x3d   : > { %v2135_v56 = vld [vmem:[#allocation6 + $0x20] sm:$0xff]  ;;  %v2137_v57 = vld [vmem:[#allocation6 + $0x28] sm:$0xff] }
  0x3f   : > { %455 = vrot.lane.b32.xlu1 %v2019_v1, %s1851_s25  ;;  %469 = vrot.lane.b32.xlu0 %v2019_v1, %s2555_s26  ;;  %s327_s26 = sand.u32 1, %s1835_s28  }
  0x43   : > { %441 = vrot.lane.b32.xlu1 %v2019_v1, %s1853_s10  ;;  %439 = vrot.lane.b32.xlu0 %v2012_v0, %s1853_s10 }
  0x47   : > { %427 = vrot.lane.b32.xlu1 %v2019_v1, %s1854_s12  ;;  %425 = vrot.lane.b32.xlu0 %v2012_v0, %s1854_s12 }
  0x4b   : > { %411 = vrot.lane.b32.xlu1 %v2019_v1, %s1855_s13  ;;  %409 = vrot.lane.b32.xlu0 %v2012_v0, %s1855_s13 }
  0x4f   : > { %397 = vrot.lane.b32.xlu1 %v2019_v1, %s1857_s18  ;;  %395 = vrot.lane.b32.xlu0 %v2012_v0, %s1857_s18 }
  0x53   : > { %383 = vrot.lane.b32.xlu1 %v2019_v1, %s1858_s21  ;;  %381 = vrot.lane.b32.xlu0 %v2012_v0, %s1858_s21 }
  0x57   : > { %370 = vrot.lane.b32.xlu1 %v2019_v1, %s2557_s23  ;;  %368 = vrot.lane.b32.xlu0 %v2012_v0, %s2557_s23  ;;  %s1526_s23 = sshll.u32 %s327_s26, 5 }
  0x5b   : > { %503 = vperm.xlu1 %1685, %v2055_v4   ;;  %508 = vperm.xlu0 %1684, %v2060_v5  }
  0xad   : > { %v454_v8 = vpop.permute.xlu1 %453  ;;  %v468_v9 = vpop.permute.xlu0 %467 }
  0xb1   : > { %v456_v12 = vpop.permute.xlu1 %455  ;;  %v470_v13 = vpop.permute.xlu0 %469 }
  0xb2   : > { %v459_v15 = vsel %vm457_vm0, %v456_v12, %v454_v8  ;;  %v472_v16 = vsel %vm471_vm1, %v468_v9, %v470_v13  ;;  %v473_v17 = vsel %vm471_vm1, %v470_v13, %v468_v9  ;;  %v458_v19 = vsel %vm457_vm0, %v454_v8, %v456_v12 }
  0xb3   : > { %v478_v20 = vmul.f32 %v2068_v10, %v473_v17  ;;  %v477_v21 = vmul.f32 %v2070_v11, %v472_v16  ;;  %v464_v24 = vmul.f32 %v2072_v14, %v459_v15  ;;  %v463_v27 = vmul.f32 %v2080_v18, %v458_v19  ;;  %v481_v16 = vld [vmem:[%s2547_s2] sm:$0xff]  ;;  %v482_v17 = vld [vmem:[%s2547_s2 + $0x8] sm:$0xff] }
  0xb5   : > { %v442_v25 = vpop.permute.xlu1 %441  ;;  %532 = vmatprep.subr.mxu0 %v478_v20  ;;  %v440_v26 = vpop.permute.xlu0 %439 }
  0xb6   : > { %v444_v28 = vsel %vm443_vm2, %v440_v26, %v442_v25  ;;  %v445_v29 = vsel %vm443_vm2, %v442_v25, %v440_v26  ;;  %533 = vmatpush1.msra.mxu0 %v477_v21 }
  0xb7   : > { %v449_v30 = vmul.f32 %v2087_v22, %v444_v28  ;;  %v450_v31 = vmul.f32 %v2089_v23, %v445_v29  ;;  %534 = vmatprep.subr.mxu0 %v464_v24 }
  0xb8   : > { %535 = vmatpush1.msra.mxu0 %v463_v27 }
  0xb9   : > { %v428_v34 = vpop.permute.xlu1 %427  ;;  %536 = vmatprep.subr.mxu0 %v450_v31  ;;  %v426_v35 = vpop.permute.xlu0 %425 }
  0xba   : > { %v430_v36 = vsel %vm429_vm3, %v426_v35, %v428_v34  ;;  %v431_v37 = vsel %vm429_vm3, %v428_v34, %v426_v35  ;;  %537 = vmatpush1.msra.mxu0 %v449_v30 }
  0xbb   : > { %v435_v38 = vmul.f32 %v2100_v32, %v430_v36  ;;  %v436_v39 = vmul.f32 %v2102_v33, %v431_v37 }
  0xbd   : > { %v412_v42 = vpop.permute.xlu1 %411  ;;  %538 = vmatprep.subr.mxu0 %v436_v39  ;;  %v410_v43 = vpop.permute.xlu0 %409 }
  0xbe   : > { %v414_v44 = vsel %vm413_vm4, %v410_v43, %v412_v42  ;;  %v415_v45 = vsel %vm413_vm4, %v412_v42, %v410_v43  ;;  %539 = vmatpush1.msra.mxu0 %v435_v38  ;;  %v611_v43 = vld [vmem:[#allocation3] sm:$0xff] }
  0xbf   : > { %v419_v46 = vmul.f32 %v2111_v40, %v415_v45  ;;  %v420_v47 = vmul.f32 %v2113_v41, %v414_v44  ;;  %540 = vmatprep.subr.mxu0 %v2019_v1  ;;  %v2148_v1 = vld [vmem:[#allocation6 + $0x8] sm:$0xff]  ;;  %v345_v44 = vstv %s1937_s9  ;;  %v339_v45 = vld [vmem:[%s2546_s1] sm:$0xff] }
  0xc0   : > { %541 = vmatpush1.msra.mxu0 %v2012_v0  ;;  %v2146_v0 = vld [vmem:[#allocation6] sm:$0xff]  ;;  %vm2193_vm10 = vcmp.eq.s32.totalorder %v2064_v7, %v345_v44  ;;  %v995_v7 = vld [vmem:[%s2548_s3 + $0x10] sm:$0xff] }
  0xc1   : > { %v398_v50 = vpop.permute.xlu1 %397  ;;  %542 = vmatprep.subr.mxu0 %v420_v47  ;;  %v396_v51 = vpop.permute.xlu0 %395  ;;  %v349_v47 = vsel %vm2193_vm10, %v339_v45, 0.0 }
  0xc2   : > { %v400_v52 = vsel %vm399_vm5, %v396_v51, %v398_v50  ;;  %v401_v53 = vsel %vm399_vm5, %v398_v50, %v396_v51  ;;  %543 = vmatpush1.msra.mxu0 %v419_v46  ;;  %v340_v50 = vld [vmem:[%s2546_s1 + $0x8] sm:$0xff]  ;;  %v342_v51 = vld [vmem:[%s2546_s1 + $0x18] sm:$0xff] }
  0xc3   : > { %v405_v54 = vmul.f32 %v2124_v48, %v401_v53  ;;  %v406_v55 = vmul.f32 %v2126_v49, %v400_v52  ;;  %v354_v52 = vsel %vm353_vm11, %v349_v47, 0.0  ;;  %v350_v53 = vsel %vm2193_vm10, %v340_v50, 0.0 }
  0xc5   : > { %v384_v58 = vpop.permute.xlu1 %383  ;;  %544 = vmatprep.subr.mxu0 %v406_v55  ;;  %v382_v59 = vpop.permute.xlu0 %381  ;;  %v357_v55 = vsel %vm353_vm11, %v350_v53, 0.0 }
  0xc6   : > { %v386_v60 = vsel %vm385_vm6, %v382_v59, %v384_v58  ;;  %v387_v61 = vsel %vm385_vm6, %v384_v58, %v382_v59  ;;  %545 = vmatpush1.msra.mxu0 %v405_v54  ;;  %v352_v54 = vsel %vm2193_vm10, %v342_v51, 0.0 }
  0xc7   : > { %v391_v62 = vmul.f32 %v2135_v56, %v387_v61  ;;  %v392_v63 = vmul.f32 %v2137_v57, %v386_v60  ;;  %v363_v58 = vsel %vm353_vm11, %v352_v54, 0.0 }
  0xc9   : > { %v371_v6 = vpop.permute.xlu1 %370  ;;  %546 = vmatprep.subr.mxu0 %v392_v63  ;;  %v369_v8 = vpop.permute.xlu0 %368  ;;  %v2212_v63 = vld [vmem:[#allocation3 + $0x8] sm:$0xff] }
  0xca   : > { %v373_v9 = vsel %vm372_vm7, %v369_v8, %v371_v6  ;;  %v374_v12 = vsel %vm372_vm7, %v371_v6, %v369_v8  ;;  %547 = vmatpush1.msra.mxu0 %v391_v62  ;;  %v2214_v6 = vld [vmem:[#allocation3 + $0x10] sm:$0xff]  ;;  %v2220_v8 = vld [vmem:[#allocation3 + $0x18] sm:$0xff] }
  0xcb   : > { %v377_v13 = vmul.f32 %v2146_v0, %v374_v12  ;;  %v378_v15 = vmul.f32 %v2148_v1, %v373_v9  ;;  %v341_v9 = vld [vmem:[%s2546_s1 + $0x10] sm:$0xff] }
  0xcc   : > { %v351_v12 = vsel %vm2193_vm10, %v341_v9, 0.0 }
  0xcd   : > { %548 = vmatprep.subr.mxu0 %v378_v15 }
  0xce   : > { %549 = vmatpush1.msra.mxu0 %v377_v13  ;;  %v360_v13 = vsel %vm353_vm11, %v351_v12, 0.0 }
  0xcf   : > { %1529 = vmatmul.mubr.msk.f32.vlgmr.msra.gmra.mxu0 %vm511_vm8, %v481_v16 }
  0xd0   : > { %588 = vmatprep.mubr.f32.mxu0 %v1856_v2 }
  0xd3   : > { %1530 = vmatmul.mubr.msk.f32.gmra.mxu0 %vm511_vm8, %v482_v17 }
  0xd4   : > { %1573 = vmatprep.mubr.msk.f32.mxu0 %vm615_vm9, %v611_v43 }
  0xd6   : > { %v504_v19 = vpop.permute.xlu1 %503  ;;  %v509_v25 = vpop.permute.xlu0 %508 }
 0x18f   : > { %v584_v20 = vpop.f32.mrf.mxu0 }
 0x190   : > { %v2163_v21 = vadd.f32 %v584_v20, %v504_v19 }
 0x191   : > { %v586_v24 = vpop.f32.mrf.mxu0 }
 0x192   : > { %v2165_v26 = vadd.f32 %v586_v24, %v504_v19  ;;  %v601_v29 = vmul.f32 %v2163_v21, %v2163_v21 }
 0x193   : > { %v590_v27 = vpop.f32.mrf.mxu0 }
 0x194   : > { %v2167_v28 = vadd.f32 %v590_v27, %v509_v25  ;;  %v602_v30 = vmul.f32 %v2165_v26, %v2165_v26  ;;  %v595_v42 = vadd.f32 %v2165_v26, %v2163_v21 }
 0x195   : > { %v592_v31 = vpop.f32.mrf.mxu0 }
 0x196   : > { %v2173_v34 = vadd.f32 %v592_v31, %v509_v25  ;;  %v605_v35 = vadd.f32 %v602_v30, %v601_v29  ;;  %v603_v36 = vmul.f32 %v2167_v28, %v2167_v28 }
 0x198   : > { %606 = vadd.xlane.f32.xlu0 %v605_v35  ;;  %v604_v37 = vmul.f32 %v2173_v34, %v2173_v34  ;;  %v598_v39 = vadd.f32 %v2173_v34, %v2167_v28 }
 0x19a   : > { %v608_v38 = vadd.f32 %v604_v37, %v603_v36 }
 0x19c   : > { %609 = vadd.xlane.f32.xlu1 %v608_v38  ;;  %599 = vadd.xlane.f32.xlu0 %v598_v39 }
 0x1a0   : > { %596 = vadd.xlane.f32.xlu1 %v595_v42 }
 0x1b1   : > { %721 = vrot.lane.b32.xlu1 %v2055_v4, %s1854_s12 }
 0x1b2   : > { %723 = vrot.lane.b32.xlu0 %v2060_v5, %s1854_s12 }
 0x1d1   : > { %355 = vadd.xlane.f32.xlu0 %v354_v52  ;;  %v1862_v52 = vmov 2  }
 0x1d5   : > { %358 = vadd.xlane.f32.xlu1 %v357_v55  ;;  %364 = vadd.xlane.f32.xlu0 %v363_v58 }
 0x1d9   : > { %361 = vadd.xlane.f32.xlu1 %v360_v13 }
 0x221   : > { %v607_v59 = vpop.xlane.xlu0 %606 }
 0x225   : > { %v610_v60 = vpop.xlane.xlu1 %609  ;;  %v600_v61 = vpop.xlane.xlu0 %599 }
 0x226   : > { %1565 = vmatprep.subr.mxu0 %v610_v60 }
 0x227   : > { %1566 = vmatpush3.msra.mxu0 %v610_v60 }
 0x228   : > { %1567 = vmatprep.subr.mxu0 %v607_v59 }
 0x229   : > { %1568 = vmatpush3.msra.mxu0 %v607_v59  ;;  %v597_v62 = vpop.xlane.xlu1 %596  ;;  %v724_v31 = vpop.permute.xlu0 %723 }
 0x22a   : > { %1569 = vmatprep.subr.mxu0 %v600_v61 }
 0x22b   : > { %1570 = vmatpush3.msra.mxu0 %v600_v61 }
 0x22c   : > { %1571 = vmatprep.subr.mxu0 %v597_v62 }
 0x22d   : > { %1572 = vmatpush3.msra.mxu0 %v597_v62  ;;  %v722_v35 = vpop.permute.xlu1 %721 }
 0x22e   : > { %1574 = vmatmul.mubr.msk.f32.vlgmr.msra.gmra.mxu0 %vm615_vm9, %v2212_v63 }
 0x22f   : > { %1576 = vmatprep.mubr.msk.f32.mxu0 %vm615_vm9, %v2214_v6 }
 0x232   : > { %1577 = vmatmul.mubr.msk.f32.gmra.mxu0 %vm615_vm9, %v2220_v8 }
 0x233   : > { %1587 = vmatprep.mubr.msk.f32.mxu0 %vm615_vm9, %v611_v43 }
 0x25a   : > { %v356_v37 = vpop.xlane.xlu0 %355 }
 0x25b   : > { %v741_v45 = vadd.f32 1.0, %v356_v37 }
 0x25e   : > { %v359_v42 = vpop.xlane.xlu1 %358  ;;  %v365_v53 = vpop.xlane.xlu0 %364 }
 0x25f   : > { %v742_v47 = vadd.f32 1.0, %v359_v42 }
 0x262   : > { %v362_v54 = vpop.xlane.xlu1 %361 }
 0x2ee   : > { %v1575_v15 = vpop.f32.mrf.mxu0 }
 0x2ef   : > { %v714_v17 = vmul.f32 %v1575_v15, %v1575_v15 }
 0x2f0   : > { %v694_v16 = vpop.f32.mrf.mxu0 }
 0x2f1   : > { %v713_v20 = vmul.f32 %v694_v16, %v694_v16 }
 0x2f2   : > { %v1578_v19 = vpop.f32.mrf.mxu0 }
 0x2f3   : > { %v716_v24 = vsub.f32 %v1578_v19, %v714_v17 }
 0x2f4   : > { %v704_v25 = vpop.f32.mrf.mxu0 }
 0x2f5   : > { %v718_v27 = vadd.f32 1e-05, %v716_v24  ;;  %v715_v29 = vsub.f32 %v704_v25, %v713_v20 }
 0x2f7   : > { %1695 = vrsqrt.f32 %v718_v27  ;;  %v717_v30 = vadd.f32 1e-05, %v715_v29 }
 0x2f9   : > { %1697 = vrsqrt.f32 %v717_v30 }
 0x304   : > { %v1696_v36 = vpop.eup %1695 }
 0x305   : > { %v728_v38 = vmul.f32 %v1696_v36, %v724_v31 }
 0x306   : > { %v1698_v39 = vpop.eup %1697 }
 0x307   : > { %v727_v43 = vmul.f32 %v1698_v39, %v722_v35  ;;  %v730_v44 = vmul.f32 %v1575_v15, %v728_v38  ;;  %v744_v51 = vmul.f32 %v742_v47, %v728_v38 }
 0x309   : > { %v729_v46 = vmul.f32 %v727_v43, %v694_v16  ;;  %735 = vrot.lane.b32.xlu0 %v730_v44, %s1861_s19  ;;  %v743_v50 = vmul.f32 %v741_v45, %v727_v43 }
 0x30b   : > { %733 = vrot.lane.b32.xlu1 %v729_v46, %s1861_s19  ;;  %s1864_s19 = smov 124  }
 0x30d   : > { %751 = vperm.xlu0 %1684, %v743_v50  }
 0x30f   : > { %756 = vperm.xlu1 %1685, %v744_v51  }
 0x311   : > { %1687 = vset.pattern.permute.xlu0 %v1862_v52 }
 0x313   : > { %1686 = vset.pattern.permute.xlu1 %v1862_v52 }
 0x37b   : > { %v736_v55 = vpop.permute.xlu0 %735 }
 0x37c   : > { %v740_v58 = vsub.f32 %v2060_v5, %v736_v55  ;;  %v994_v55 = vld [vmem:[%s2548_s3 + $0x8] sm:$0xff] }
 0x37d   : > { %v734_v59 = vpop.permute.xlu1 %733  ;;  %1535 = vmatprep.mubr.msk.f32.mxu1 %vm1041_vm12, %v994_v55 }
 0x37e   : > { %v746_v60 = vmul.f32 %v742_v47, %v740_v58  ;;  %v739_v61 = vsub.f32 %v2055_v4, %v734_v59  ;;  %v1863_v58 = vmov 3  }
 0x380   : > { %v745_v62 = vmul.f32 %v741_v45, %v739_v61  ;;  %v748_v9 = vadd.f32 %v746_v60, %v365_v53  ;;  %v960_v61 = vld [vmem:[#allocation6 + $0xf8] sm:$0xff] }
 0x382   : > { %770 = vperm.xlu1 %1686, %v748_v9   ;;  %v747_v12 = vadd.f32 %v745_v62, %v362_v54  ;;  %v959_v62 = vld [vmem:[#allocation6 + $0xf0] sm:$0xff] }
 0x384   : > { %765 = vperm.xlu0 %1687, %v747_v12  }
 0x386   : > { %1689 = vset.pattern.permute.xlu1 %v1863_v58 }
 0x388   : > { %v752_v27 = vpop.permute.xlu0 %751  ;;  %1688 = vset.pattern.permute.xlu0 %v1863_v58  ;;  %v912_v58 = vld [vmem:[#allocation6 + $0xb8] sm:$0xff] }
 0x389   : > { %v759_v30 = vmul.f32 %v752_v27, %v2163_v21 }
 0x38a   : > { %v757_v13 = vpop.permute.xlu1 %756 }
 0x38b   : > { %v761_v15 = vmul.f32 %v757_v13, %v2167_v28  ;;  %v762_v16 = vmul.f32 %v757_v13, %v2173_v34  ;;  %v760_v28 = vmul.f32 %v752_v27, %v2165_v26 }
 0x3fd   : > { %v771_v17 = vpop.permute.xlu1 %770 }
 0x3fe   : > { %v775_v19 = vadd.f32 %v771_v17, %v761_v15  ;;  %v776_v20 = vadd.f32 %v771_v17, %v762_v16 }
 0x3ff   : > { %v766_v29 = vpop.permute.xlu0 %765 }
 0x400   : > { %v779_v24 = vmul.f32 0.5, %v775_v19  ;;  %v780_v25 = vmul.f32 0.5, %v776_v20  ;;  %v773_v31 = vadd.f32 %v766_v29, %v759_v30  ;;  %v774_v44 = vadd.f32 %v766_v29, %v760_v28  ;;  %v936_v28 = vld [vmem:[#allocation6 + $0xd8] sm:$0xff] }
 0x402   : > { %1699 = vtanh.f32 %v779_v24  ;;  %v777_v38 = vmul.f32 0.5, %v773_v31  ;;  %v778_v45 = vmul.f32 0.5, %v774_v44 }
 0x403   : > { %1701 = vtanh.f32 %v780_v25 }
 0x404   : > { %1703 = vtanh.f32 %v777_v38 }
 0x405   : > { %1705 = vtanh.f32 %v778_v45  ;;  %v935_v45 = vld [vmem:[#allocation6 + $0xd0] sm:$0xff] }
 0x40f   : > { %v1700_v35 = vpop.eup %1699 }
 0x410   : > { %v1702_v36 = vpop.eup %1701  ;;  %v787_v37 = vadd.f32 1.0, %v1700_v35 }
 0x411   : > { %v788_v39 = vadd.f32 1.0, %v1702_v36  ;;  %v1704_v26 = vpop.eup %1703 }
 0x412   : > { %v791_v34 = vmul.f32 0.5, %v787_v37  ;;  %v785_v46 = vadd.f32 1.0, %v1704_v26  ;;  %v1706_v50 = vpop.eup %1705 }
 0x413   : > { %v792_v42 = vmul.f32 0.5, %v788_v39  ;;  %v786_v51 = vadd.f32 1.0, %v1706_v50 }
 0x414   : > { %v2237_v43 = vmul.f32 %v791_v34, %v775_v19  ;;  %v789_v47 = vmul.f32 0.5, %v785_v46 }
 0x415   : > { %v2243_v21 = vmul.f32 %v792_v42, %v776_v20  ;;  %v790_v53 = vmul.f32 0.5, %v786_v51 }
 0x416   : > { %923 = vrot.lane.b32.xlu0 %v2237_v43, %s1853_s10  ;;  %947 = vrot.lane.b32.xlu1 %v2237_v43, %s1851_s25  ;;  %v2265_v52 = vmul.f32 %v789_v47, %v773_v31 }
 0x417   : > { %v2275_v54 = vmul.f32 %v790_v53, %v774_v44 }
 0x41a   : > { %899 = vrot.lane.b32.xlu0 %v2237_v43, %s1854_s12  ;;  %951 = vrot.lane.b32.xlu1 %v2243_v21, %s1851_s25 }
 0x41e   : > { %871 = vrot.lane.b32.xlu0 %v2237_v43, %s1855_s13  ;;  %927 = vrot.lane.b32.xlu1 %v2243_v21, %s1853_s10 }
 0x422   : > { %847 = vrot.lane.b32.xlu0 %v2237_v43, %s1857_s18  ;;  %903 = vrot.lane.b32.xlu1 %v2243_v21, %s1854_s12 }
 0x426   : > { %823 = vrot.lane.b32.xlu0 %v2237_v43, %s1858_s21  ;;  %875 = vrot.lane.b32.xlu1 %v2243_v21, %s1855_s13 }
 0x42a   : > { %799 = vrot.lane.b32.xlu0 %v2237_v43, %s2569_s20  ;;  %851 = vrot.lane.b32.xlu1 %v2243_v21, %s1857_s18 }
 0x42e   : > { %945 = vrot.lane.b32.xlu0 %v2265_v52, %s1851_s25  ;;  %827 = vrot.lane.b32.xlu1 %v2243_v21, %s1858_s21 }
 0x432   : > { %921 = vrot.lane.b32.xlu0 %v2265_v52, %s1853_s10  ;;  %803 = vrot.lane.b32.xlu1 %v2243_v21, %s2569_s20 }
 0x436   : > { %897 = vrot.lane.b32.xlu0 %v2265_v52, %s1854_s12  ;;  %949 = vrot.lane.b32.xlu1 %v2275_v54, %s1851_s25 }
 0x43a   : > { %971 = vrot.lane.b32.xlu0 %v2237_v43, %s2570_s22  ;;  %925 = vrot.lane.b32.xlu1 %v2275_v54, %s1853_s10 }
 0x43e   : > { %869 = vrot.lane.b32.xlu0 %v2265_v52, %s1855_s13  ;;  %901 = vrot.lane.b32.xlu1 %v2275_v54, %s1854_s12 }
 0x442   : > { %845 = vrot.lane.b32.xlu0 %v2265_v52, %s1857_s18  ;;  %975 = vrot.lane.b32.xlu1 %v2243_v21, %s2570_s22 }
 0x446   : > { %821 = vrot.lane.b32.xlu0 %v2265_v52, %s1858_s21  ;;  %873 = vrot.lane.b32.xlu1 %v2275_v54, %s1855_s13  ;;  %s1868_s13 = smov [#allocation8]  }
 0x44a   : > { %797 = vrot.lane.b32.xlu0 %v2265_v52, %s2569_s20  ;;  %849 = vrot.lane.b32.xlu1 %v2275_v54, %s1857_s18  ;;  %s1779_s18 = sshll.u32 %s1868_s13, 4  ;;  %s1780_s18 = int_to_ptr.vmem [resolvable:$false] %s1779_s18 }
 0x44b   : > { %s1781_s17 = scalar_lea.vmem %s1780_s18, 1024 }
 0x44e   : > { %969 = vrot.lane.b32.xlu0 %v2265_v52, %s2570_s22  ;;  %825 = vrot.lane.b32.xlu1 %v2275_v54, %s1858_s21 }
 0x452   : > { %801 = vrot.lane.b32.xlu1 %v2275_v54, %s2569_s20  ;;  %1038 = vperm.xlu0 %1688, %v2060_v5  }
 0x456   : > { %973 = vrot.lane.b32.xlu1 %v2275_v54, %s2570_s22  ;;  %1691 = vset.pattern.permute.xlu0 %v1859_v3  ;;  %s1548_s22 = sshll.u32 %s1937_s9, 8  ;;  %s2504_s9 = scalar_lea.sflag [#allocation5], %s327_s26 }
 0x45a   : > { %1034 = vperm.xlu1 %1689, %v2055_v4  }
 0x45e   : > { %1690 = vset.pattern.permute.xlu1 %v1859_v3 }
 0x488   : > { %v924_v59 = vpop.permute.xlu0 %923  ;;  %v948_v60 = vpop.permute.xlu1 %947 }
 0x48c   : > { %v900_v9 = vpop.permute.xlu0 %899  ;;  %v952_v12 = vpop.permute.xlu1 %951 }
 0x48d   : > { %v954_v13 = vsel %vm457_vm0, %v948_v60, %v952_v12  ;;  %v956_v15 = vsel %vm457_vm0, %v952_v12, %v948_v60 }
 0x48e   : > { %v964_v16 = vmul.f32 %v960_v61, %v956_v15  ;;  %v963_v17 = vmul.f32 %v959_v62, %v954_v13 }
 0x490   : > { %v872_v19 = vpop.permute.xlu0 %871  ;;  %1048 = vmatprep.subr.mxu1 %v964_v16  ;;  %v928_v20 = vpop.permute.xlu1 %927 }
 0x491   : > { %1049 = vmatpush1.msra.mxu1 %v963_v17  ;;  %v932_v34 = vsel %vm443_vm2, %v928_v20, %v924_v59  ;;  %v930_v26 = vsel %vm443_vm2, %v924_v59, %v928_v20 }
 0x492   : > { %v940_v50 = vmul.f32 %v936_v28, %v932_v34  ;;  %v939_v55 = vmul.f32 %v935_v45, %v930_v26 }
 0x494   : > { %v2321_v24 = vpop.permute.xlu0 %847  ;;  %v904_v3 = vpop.permute.xlu1 %903 }
 0x495   : > { %v908_v60 = vsel %vm429_vm3, %v904_v3, %v900_v9 }
 0x496   : > { %v916_v13 = vmul.f32 %v912_v58, %v908_v60 }
 0x498   : > { %v2323_v25 = vpop.permute.xlu0 %823  ;;  %v876_v27 = vpop.permute.xlu1 %875 }
 0x499   : > { %v880_v28 = vsel %vm413_vm4, %v876_v27, %v872_v19 }
 0x49c   : > { %v2325_v29 = vpop.permute.xlu0 %799  ;;  %v2327_v30 = vpop.permute.xlu1 %851 }
 0x4a0   : > { %v946_v31 = vpop.permute.xlu0 %945  ;;  %v2329_v35 = vpop.permute.xlu1 %827 }
 0x4a4   : > { %v922_v36 = vpop.permute.xlu0 %921  ;;  %v2331_v37 = vpop.permute.xlu1 %803 }
 0x4a8   : > { %v898_v38 = vpop.permute.xlu0 %897  ;;  %v950_v39 = vpop.permute.xlu1 %949 }
 0x4a9   : > { %v953_v42 = vsel %vm457_vm0, %v946_v31, %v950_v39  ;;  %v955_v44 = vsel %vm457_vm0, %v950_v39, %v946_v31  ;;  %v883_v39 = vld [vmem:[#allocation6 + $0x70] sm:$0xff] }
 0x4aa   : > { %v961_v46 = vmul.f32 %v953_v42, %v2080_v18  ;;  %v962_v47 = vmul.f32 %v955_v44, %v2072_v14  ;;  %v911_v18 = vld [vmem:[#allocation6 + $0xb0] sm:$0xff]  ;;  %v906_v14 = vsel %vm429_vm3, %v900_v9, %v904_v3  ;;  %v884_v3 = vld [vmem:[#allocation6 + $0x78] sm:$0xff]  ;;  %v887_v34 = vmul.f32 %v883_v39, %v880_v28 }
 0x4ab   : > { %v915_v17 = vmul.f32 %v911_v18, %v906_v14  ;;  %v860_v42 = vld [vmem:[#allocation6 + $0x58] sm:$0xff]  ;;  %v854_v44 = vsel %vm399_vm5, %v2321_v24, %v2327_v30  ;;  %v806_v14 = vsel %vm372_vm7, %v2325_v29, %v2331_v37 }
 0x4ac   : > { %v2343_v51 = vpop.permute.xlu0 %971  ;;  %1050 = vmatprep.subr.mxu1 %v962_v47  ;;  %v926_v53 = vpop.permute.xlu1 %925  ;;  %v864_v26 = vmul.f32 %v860_v42, %v854_v44  ;;  %v812_v18 = vld [vmem:[#allocation6 + $0x18] sm:$0xff] }
 0x4ad   : > { %v929_v61 = vsel %vm443_vm2, %v922_v36, %v926_v53  ;;  %v931_v59 = vsel %vm443_vm2, %v926_v53, %v922_v36  ;;  %1051 = vmatpush1.msra.mxu1 %v961_v46  ;;  %v878_v36 = vsel %vm413_vm4, %v872_v19, %v876_v27  ;;  %v836_v53 = vld [vmem:[#allocation6 + $0x38] sm:$0xff] }
 0x4ae   : > { %v937_v62 = vmul.f32 %v929_v61, %v2087_v22  ;;  %v938_v12 = vmul.f32 %v931_v59, %v2089_v23  ;;  %1052 = vmatprep.subr.mxu1 %v940_v50 }
 0x4af   : > { %1053 = vmatpush1.msra.mxu1 %v939_v55 }
 0x4b0   : > { %v870_v15 = vpop.permute.xlu0 %869  ;;  %1054 = vmatprep.subr.mxu1 %v938_v12  ;;  %v902_v16 = vpop.permute.xlu1 %901 }
 0x4b1   : > { %v905_v20 = vsel %vm429_vm3, %v898_v38, %v902_v16  ;;  %v907_v31 = vsel %vm429_vm3, %v902_v16, %v898_v38  ;;  %1055 = vmatpush1.msra.mxu1 %v937_v62 }
 0x4b2   : > { %v913_v9 = vmul.f32 %v905_v20, %v2100_v32  ;;  %v914_v22 = vmul.f32 %v907_v31, %v2102_v33  ;;  %1056 = vmatprep.subr.mxu1 %v916_v13  ;;  %v888_v32 = vmul.f32 %v884_v3, %v878_v36  ;;  %v984_v20 = vld [vmem:[#allocation6 + $0x118] sm:$0xff] }
 0x4b3   : > { %1057 = vmatpush1.msra.mxu1 %v915_v17 }
 0x4b4   : > { %1058 = vmatprep.subr.mxu1 %v914_v22  ;;  %v2361_v23 = vpop.permute.xlu1 %975  ;;  %v846_v38 = vpop.permute.xlu0 %845 }
 0x4b5   : > { %1059 = vmatpush1.msra.mxu1 %v913_v9  ;;  %v980_v31 = vsel %vm471_vm1, %v2361_v23, %v2343_v51 }
 0x4b6   : > { %1060 = vmatprep.subr.mxu1 %v2243_v21  ;;  %v856_v21 = vsel %vm399_vm5, %v2327_v30, %v2321_v24  ;;  %v832_v30 = vsel %vm385_vm6, %v2329_v35, %v2323_v25  ;;  %v988_v3 = vmul.f32 %v984_v20, %v980_v31  ;;  %v1721_v20 = vld [vmem:[%s2550_s5] sm:$0xff]  ;;  %v1867_v31 = vmov 5  }
 0x4b7   : > { %1061 = vmatpush1.msra.mxu1 %v2237_v43  ;;  %v859_v43 = vld [vmem:[#allocation6 + $0x50] sm:$0xff] }
 0x4b8   : > { %1062 = vmatprep.subr.mxu1 %v2275_v54  ;;  %v874_v33 = vpop.permute.xlu1 %873  ;;  %v822_v46 = vpop.permute.xlu0 %821  ;;  %v863_v50 = vmul.f32 %v859_v43, %v856_v21 }
 0x4b9   : > { %v877_v45 = vsel %vm413_vm4, %v870_v15, %v874_v33  ;;  %v879_v19 = vsel %vm413_vm4, %v874_v33, %v870_v15  ;;  %1063 = vmatpush1.msra.mxu1 %v2265_v52  ;;  %v830_v52 = vsel %vm385_vm6, %v2323_v25, %v2329_v35  ;;  %v808_v25 = vsel %vm372_vm7, %v2331_v37, %v2325_v29 }
 0x4ba   : > { %v885_v54 = vmul.f32 %v879_v19, %v2111_v40  ;;  %v886_v27 = vmul.f32 %v877_v45, %v2113_v41  ;;  %1064 = vmatprep.subr.mxu1 %v888_v32  ;;  %v835_v41 = vld [vmem:[#allocation6 + $0x30] sm:$0xff]  ;;  %v840_v60 = vmul.f32 %v836_v53, %v830_v52  ;;  %v816_v15 = vmul.f32 %v812_v18, %v806_v14 }
 0x4bb   : > { %1065 = vmatpush1.msra.mxu1 %v887_v34  ;;  %v839_v59 = vmul.f32 %v835_v41, %v832_v30  ;;  %v978_v37 = vsel %vm471_vm1, %v2343_v51, %v2361_v23  ;;  %v996_v23 = vld [vmem:[%s2548_s3 + $0x18] sm:$0xff]  ;;  %v1318_v30 = vld [vmem:[%s2549_s4] sm:$0xff] }
 0x4bc   : > { %1066 = vmatprep.subr.mxu1 %v886_v27  ;;  %v850_v47 = vpop.permute.xlu1 %849  ;;  %v798_v35 = vpop.permute.xlu0 %797 }
 0x4bd   : > { %v853_v24 = vsel %vm399_vm5, %v846_v38, %v850_v47  ;;  %v855_v40 = vsel %vm399_vm5, %v850_v47, %v846_v38  ;;  %1067 = vmatpush1.msra.mxu1 %v885_v54 }
 0x4be   : > { %v861_v55 = vmul.f32 %v855_v40, %v2124_v48  ;;  %v862_v58 = vmul.f32 %v853_v24, %v2126_v49  ;;  %1068 = vmatprep.subr.mxu1 %v864_v26  ;;  %v811_v49 = vld [vmem:[#allocation6 + $0x10] sm:$0xff] }
 0x4bf   : > { %1069 = vmatpush1.msra.mxu1 %v863_v50  ;;  %v815_v17 = vmul.f32 %v811_v49, %v808_v25 }
 0x4c0   : > { %1070 = vmatprep.subr.mxu1 %v862_v58  ;;  %v826_v61 = vpop.permute.xlu1 %825  ;;  %v970_v36 = vpop.permute.xlu0 %969 }
 0x4c1   : > { %v829_v62 = vsel %vm385_vm6, %v822_v46, %v826_v61  ;;  %v831_v48 = vsel %vm385_vm6, %v826_v61, %v822_v46  ;;  %1071 = vmatpush1.msra.mxu1 %v861_v55 }
 0x4c2   : > { %v837_v12 = vmul.f32 %v831_v48, %v2135_v56  ;;  %v838_v13 = vmul.f32 %v829_v62, %v2137_v57  ;;  %1072 = vmatprep.subr.mxu1 %v840_v60  ;;  %v983_v57 = vld [vmem:[#allocation6 + $0x110] sm:$0xff] }
 0x4c3   : > { %1073 = vmatpush1.msra.mxu1 %v839_v59  ;;  %v987_v28 = vmul.f32 %v983_v57, %v978_v37  ;;  %v1722_v37 = vld [vmem:[%s2550_s5 + $0x8] sm:$0xff] }
 0x4c4   : > { %1074 = vmatprep.subr.mxu1 %v838_v13  ;;  %v802_v16 = vpop.permute.xlu1 %801 }
 0x4c5   : > { %v805_v29 = vsel %vm372_vm7, %v798_v35, %v802_v16  ;;  %v807_v56 = vsel %vm372_vm7, %v802_v16, %v798_v35  ;;  %1075 = vmatpush1.msra.mxu1 %v837_v12 }
 0x4c6   : > { %v813_v9 = vmul.f32 %v807_v56, %v2146_v0  ;;  %v814_v22 = vmul.f32 %v805_v29, %v2148_v1  ;;  %1076 = vmatprep.subr.mxu1 %v816_v15  ;;  %v993_v1 = vld [vmem:[%s2548_s3] sm:$0xff] }
 0x4c7   : > { %1077 = vmatpush1.msra.mxu1 %v815_v17  ;;  %v1866_v17 = vmov 6  }
 0x4c8   : > { %1078 = vmatprep.subr.mxu1 %v814_v22  ;;  %v974_v39 = vpop.permute.xlu1 %973 }
 0x4c9   : > { %v977_v38 = vsel %vm471_vm1, %v970_v36, %v974_v39  ;;  %v979_v32 = vsel %vm471_vm1, %v974_v39, %v970_v36  ;;  %1079 = vmatpush1.msra.mxu1 %v813_v9 }
 0x4ca   : > { %v985_v51 = vmul.f32 %v977_v38, %v2070_v11  ;;  %v986_v0 = vmul.f32 %v979_v32, %v2068_v10  ;;  %1108 = vmatprep.subr.mxu1 %v988_v3 }
 0x4cb   : > { %1109 = vmatpush2.msra.mxu1 %v987_v28 }
 0x4cc   : > { %1110 = vmatprep.subr.mxu1 %v986_v0 }
 0x4cd   : > { %1111 = vmatpush2.msra.mxu1 %v985_v51  ;;  %v1039_v42 = vpop.permute.xlu0 %1038 }
 0x4ce   : > { %1113 = vmatmul.mubr.f32.vlgmr.msra.gmra.mxu1 %v993_v1 }
 0x4cf   : > { %1536 = vmatprep.mubr.msk.f32.mxu1 %vm1041_vm12, %v996_v23 }
 0x4d2   : > { %1119 = vmatmul.mubr.f32.gmra.mxu1 %v995_v7 }
 0x4d3   : > { %1590 = vmatprep.mubr.msk.f32.mxu1 %vm615_vm9, %v2214_v6 }
 0x4d5   : > { %v1035_v10 = vpop.permute.xlu1 %1034 }
 0x58e   : > { %v1114_v11 = vpop.f32.mrf.mxu1 }
 0x58f   : > { %v2445_v33 = vadd.f32 %v1114_v11, %v1035_v10 }
 0x590   : > { %v1116_v34 = vpop.f32.mrf.mxu1 }
 0x591   : > { %v2447_v44 = vadd.f32 %v1116_v34, %v1035_v10  ;;  %v1131_v43 = vmul.f32 %v2445_v33, %v2445_v33 }
 0x592   : > { %v1120_v45 = vpop.f32.mrf.mxu1 }
 0x593   : > { %v2449_v19 = vadd.f32 %v1120_v45, %v1039_v42  ;;  %v1132_v21 = vmul.f32 %v2447_v44, %v2447_v44  ;;  %v1125_v53 = vadd.f32 %v2447_v44, %v2445_v33 }
 0x594   : > { %v1122_v54 = vpop.f32.mrf.mxu1 }
 0x595   : > { %v2455_v27 = vadd.f32 %v1122_v54, %v1039_v42  ;;  %v1135_v6 = vadd.f32 %v1132_v21, %v1131_v43  ;;  %v1133_v26 = vmul.f32 %v2449_v19, %v2449_v19 }
 0x597   : > { %1136 = vadd.xlane.f32.xlu0 %v1135_v6  ;;  %v1134_v46 = vmul.f32 %v2455_v27, %v2455_v27  ;;  %v1128_v50 = vadd.f32 %v2455_v27, %v2449_v19 }
 0x599   : > { %v1138_v47 = vadd.f32 %v1134_v46, %v1133_v26 }
 0x59b   : > { %1139 = vadd.xlane.f32.xlu1 %v1138_v47  ;;  %1129 = vadd.xlane.f32.xlu0 %v1128_v50 }
 0x59f   : > { %1126 = vadd.xlane.f32.xlu1 %v1125_v53 }
 0x5b0   : > { %1252 = vrot.lane.b32.xlu1 %v2060_v5, %s1864_s19  ;;  %v1720_v5 = vld [vmem:[%s2009_s24] sm:$0xff] }
 0x5b1   : > { %1250 = vrot.lane.b32.xlu0 %v2055_v4, %s1864_s19  ;;  %v1719_v4 = vld [vmem:[%s2009_s24 + $0x8] sm:$0xff]  ;;  %s1865_s24 = smov 5   ;;  %s329_s19 = scalar_lea.vmem [#allocation8], %s1526_s23 }
 0x5b2   : > { %s1434_s20 = sshll.u32 %s329_s19, 4  ;;  %s2495_s20 = int_to_ptr.vmem [resolvable:$true] %s1434_s20 }
 0x5b3   : > { %s1775_s12 = scalar_lea.vmem %s2495_s20, 512  ;;  %p1782_p11 = scmp.lt.s32.totalorder %s2495_s20, %s1780_s18 }
 0x5b4   : > { %p1776_p10 = scmp.ne.s32.totalorder %s2495_s20, %s1775_s12  ;;  %p1783_p0 = scmp.lt.s32.totalorder %s1781_s17, %s1775_s12 }
 0x5b6   : > { %p1777_p12 = pnand %p1776_p10, %p1954_p5  ;;  %p1784_p1 = por %p1783_p0, %p1782_p11 }
 0x5b8   : > { %p1778_p8 = pneg %p1777_p12 }
 0x5ba   : > { %p1785_p3 = pnand %p1784_p1, %p1778_p8 }
 0x620   : > { %v1137_v52 = vpop.xlane.xlu0 %1136 }
 0x624   : > { %v1140_v24 = vpop.xlane.xlu1 %1139  ;;  %v1130_v40 = vpop.xlane.xlu0 %1129 }
 0x625   : > { %1579 = vmatprep.subr.mxu0 %v1140_v24  ;;  %1593 = vmatprep.subr.mxu1 %v1140_v24 }
 0x626   : > { %1580 = vmatpush3.msra.mxu0 %v1140_v24  ;;  %1597 = vmatpush3.msra.mxu1 %v1140_v24 }
 0x627   : > { %1581 = vmatprep.subr.mxu0 %v1137_v52  ;;  %1594 = vmatprep.subr.mxu1 %v1137_v52 }
 0x628   : > { %1582 = vmatpush3.msra.mxu0 %v1137_v52  ;;  %1598 = vmatpush3.msra.mxu1 %v1137_v52  ;;  %v1127_v41 = vpop.xlane.xlu1 %1126 }
 0x629   : > { %1583 = vmatprep.subr.mxu0 %v1130_v40  ;;  %1595 = vmatprep.subr.mxu1 %v1130_v40 }
 0x62a   : > { %1584 = vmatpush3.msra.mxu0 %v1130_v40  ;;  %1599 = vmatpush3.msra.mxu1 %v1130_v40 }
 0x62b   : > { %1585 = vmatprep.subr.mxu0 %v1127_v41  ;;  %1596 = vmatprep.subr.mxu1 %v1127_v41 }
 0x62c   : > { %1586 = vmatpush3.msra.mxu0 %v1127_v41  ;;  %1600 = vmatpush3.msra.mxu1 %v1127_v41  ;;  %v1253_v49 = vpop.permute.xlu1 %1252 }
 0x62d   : > { %1588 = vmatmul.mubr.msk.f32.vlgmr.msra.gmra.mxu0 %vm615_vm9, %v2212_v63  ;;  %1591 = vmatmul.mubr.msk.f32.vlgmr.msra.gmra.mxu1 %vm615_vm9, %v2220_v8  ;;  %v1319_v63 = vld [vmem:[%s2549_s4 + $0x8] sm:$0xff] }
 0x62e   : > { %1365 = vmatprep.subr.mxu0 %v1719_v4  ;;  %1399 = vmatprep.mubr.f32.mxu0 %v1856_v2 }
 0x62f   : > { %1366 = vmatpush1.msra.mxu0 %v1720_v5 }
 0x631   : > { %1541 = vmatmul.mubr.msk.f32.vlgmr.msra.gmra.mxu0 %vm1328_vm13, %v1318_v30 }
 0x632   : > { %1405 = vmatprep.mubr.f32.mxu0 %v1856_v2  ;;  %v1251_v2 = vpop.permute.xlu0 %1250 }
 0x635   : > { %1542 = vmatmul.mubr.msk.f32.gmra.mxu0 %vm1328_vm13, %v1319_v63 }
 0x6ed   : > { %v1589_v8 = vpop.f32.mrf.mxu0  ;;  %v1592_v55 = vpop.f32.mrf.mxu1 }
 0x6ee   : > { %v1243_v58 = vmul.f32 %v1589_v8, %v1589_v8 }
 0x6ef   : > { %v1223_v60 = vpop.f32.mrf.mxu0  ;;  %v1233_v18 = vpop.f32.mrf.mxu1 }
 0x6f0   : > { %v1245_v61 = vsub.f32 %v1592_v55, %v1243_v58  ;;  %v1242_v59 = vmul.f32 %v1223_v60, %v1223_v60 }
 0x6f1   : > { %v1401_v42 = vpop.f32.mrf.mxu0 }
 0x6f2   : > { %v1247_v14 = vadd.f32 1e-05, %v1245_v61  ;;  %v1244_v62 = vsub.f32 %v1233_v18, %v1242_v59 }
 0x6f4   : > { %1707 = vrsqrt.f32 %v1247_v14  ;;  %v1246_v48 = vadd.f32 1e-05, %v1244_v62 }
 0x6f6   : > { %1709 = vrsqrt.f32 %v1246_v48 }
 0x701   : > { %v1708_v25 = vpop.eup %1707 }
 0x702   : > { %v1257_v35 = vmul.f32 %v1708_v25, %v1253_v49 }
 0x703   : > { %v1710_v12 = vpop.eup %1709 }
 0x704   : > { %v1259_v13 = vmul.f32 %v1589_v8, %v1257_v35  ;;  %v1256_v15 = vmul.f32 %v1710_v12, %v1251_v2 }
 0x706   : > { %v1258_v16 = vmul.f32 %v1256_v15, %v1223_v60  ;;  %1264 = vrot.lane.b32.xlu0 %v1259_v13, %s1865_s24 }
 0x708   : > { %1262 = vrot.lane.b32.xlu1 %v1258_v16, %s1865_s24  ;;  %s2500_s24 = scalar_lea.hbm %s2553_s8, %s1548_s22 }
 0x70a   : > { %1277 = vperm.xlu0 %1691, %v1257_v35  }
 0x70c   : > { %1272 = vperm.xlu1 %1690, %v1256_v15  }
 0x70e   : > { %1693 = vset.pattern.permute.xlu0 %v1866_v17 }
 0x70f   : > { %1321 = vperm.xlu0 %1693, %v1721_v20  }
 0x710   : > { %1692 = vset.pattern.permute.xlu1 %v1867_v31 }
 0x778   : > { %v1265_v57 = vpop.permute.xlu0 %1264 }
 0x779   : > { %v1269_v9 = vsub.f32 %v1722_v37, %v1265_v57 }
 0x77a   : > { %v1263_v29 = vpop.permute.xlu1 %1262 }
 0x77b   : > { %v1268_v56 = vsub.f32 %v1721_v20, %v1263_v29 }
 0x77d   : > { %1286 = vperm.xlu1 %1692, %v1268_v56  }
 0x781   : > { %1291 = vperm.xlu1 %1692, %v1269_v9  }
 0x785   : > { %1694 = vset.pattern.permute.xlu1 %v1866_v17  ;;  %v1278_v39 = vpop.permute.xlu0 %1277 }
 0x786   : > { %1325 = vperm.xlu1 %1694, %v1722_v37   ;;  %v1282_v51 = vmul.f32 %v1278_v39, %v2449_v19  ;;  %v1283_v0 = vmul.f32 %v1278_v39, %v2455_v27 }
 0x787   : > { %v1273_v22 = vpop.permute.xlu1 %1272 }
 0x788   : > { %v1280_v3 = vmul.f32 %v1273_v22, %v2445_v33  ;;  %v1281_v36 = vmul.f32 %v1273_v22, %v2447_v44  ;;  %v1403_v44 = vpop.f32.mrf.mxu0 }
 0x78a   : > { %v1322_v54 = vpop.permute.xlu0 %1321  ;;  %v1407_v6 = vpop.f32.mrf.mxu0 }
 0x78b   : > { %v1402_v52 = vadd.f32 %v1401_v42, %v1322_v54  ;;  %v1404_v41 = vadd.f32 %v1403_v44, %v1322_v54 }
 0x78c   : > { %v1409_v63 = vpop.f32.mrf.mxu0 }
 0x7f8   : > { %v1287_v28 = vpop.permute.xlu1 %1286 }
 0x7f9   : > { %v1294_v38 = vadd.f32 %v1287_v28, %v1280_v3  ;;  %v1295_v32 = vadd.f32 %v1287_v28, %v1281_v36 }
 0x7fb   : > { %v1298_v1 = vmul.f32 0.5, %v1294_v38  ;;  %v1299_v23 = vmul.f32 0.5, %v1295_v32 }
 0x7fc   : > { %v1292_v7 = vpop.permute.xlu1 %1291 }
 0x7fd   : > { %1711 = vtanh.f32 %v1298_v1  ;;  %v1296_v10 = vadd.f32 %v1292_v7, %v1282_v51  ;;  %v1297_v11 = vadd.f32 %v1292_v7, %v1283_v0 }
 0x7fe   : > { %1713 = vtanh.f32 %v1299_v23 }
 0x7ff   : > { %v1300_v33 = vmul.f32 0.5, %v1296_v10  ;;  %v1301_v34 = vmul.f32 0.5, %v1297_v11 }
 0x801   : > { %1715 = vtanh.f32 %v1300_v33  ;;  %v1326_v4 = vpop.permute.xlu1 %1325 }
 0x802   : > { %1717 = vtanh.f32 %v1301_v34  ;;  %v1408_v60 = vadd.f32 %v1407_v6, %v1326_v4  ;;  %v1410_v59 = vadd.f32 %v1409_v63, %v1326_v4 }
 0x80a   : > { %v1712_v45 = vpop.eup %1711 }
 0x80b   : > { %v1714_v19 = vpop.eup %1713  ;;  %v1306_v43 = vadd.f32 1.0, %v1712_v45 }
 0x80c   : > { %v1307_v21 = vadd.f32 1.0, %v1714_v19 }
 0x80d   : > { %v1310_v27 = vmul.f32 0.5, %v1306_v43 }
 0x80e   : > { %v1716_v26 = vpop.eup %1715  ;;  %v1311_v46 = vmul.f32 0.5, %v1307_v21 }
 0x80f   : > { %v1718_v47 = vpop.eup %1717  ;;  %v1314_v50 = vmul.f32 %v1310_v27, %v1294_v38  ;;  %v1308_v53 = vadd.f32 1.0, %v1716_v26 }
 0x810   : > { %v1315_v24 = vmul.f32 %v1311_v46, %v1295_v32  ;;  %v1309_v40 = vadd.f32 1.0, %v1718_v47 }
 0x811   : > { %v1312_v5 = vmul.f32 0.5, %v1308_v53  ;;  %v1412_v30 = vadd.f32 %v1402_v52, %v1314_v50 }
 0x812   : > { %v1313_v8 = vmul.f32 0.5, %v1309_v40  ;;  %v1413_v55 = vadd.f32 %v1404_v41, %v1315_v24 }
 0x813   : > { %v1316_v58 = vmul.f32 %v1312_v5, %v1296_v10  ;;  %1416 = vst [vmem:[%s329_s19] sm:$0xff] %v1412_v30 }
 0x814   : > { %v1317_v61 = vmul.f32 %v1313_v8, %v1297_v11  ;;  %1417 = vst [vmem:[%s329_s19 + $0x8] sm:$0xff] %v1413_v55 }
 0x815   : > { %v1414_v18 = vadd.f32 %v1408_v60, %v1316_v58 }
 0x816   : > { %v1415_v14 = vadd.f32 %v1410_v59, %v1317_v61 }
 0x817   : > { %1418 = vst [vmem:[%s329_s19 + $0x10] sm:$0xff] %v1414_v18 }
 0x818   : > { %1419 = vst [vmem:[%s329_s19 + $0x18] sm:$0xff] %v1415_v14 }
 0x819   : > { %1788 = shalt.err (!%p1785_p3)
}
 0x81a   : > { %s1789_s26 = scalar_lea.hbm %s2500_s24, 512  ;;  %s1793_s22 = scalar_lea.hbm %s2553_s8, 1024 }
 0x81b   : > { %p1790_p2 = scmp.ne.s32.totalorder %s2500_s24, %s1789_s26  ;;  %p1794_p6 = scmp.lt.s32.totalorder %s2500_s24, %s2553_s8 }
 0x81c   : > { %p1795_p9 = scmp.lt.s32.totalorder %s1793_s22, %s1789_s26 }
 0x81d   : > { %p1791_p4 = pnand %p1790_p2, %p1954_p5 }
 0x81e   : > { %p1796_p7 = por %p1795_p9, %p1794_p6 }
 0x81f   : > { %p1792_p13 = pneg %p1791_p4 }
 0x821   : > { %p1797_p10 = pnand %p1796_p7, %p1792_p13 }
 0x823   : > { %1800 = shalt.err (!%p1797_p10)
}
 0x824   : > { %s1869_s12 = smov 256   ;;  %s1870_s13 = smov 512  }
 0x825   : > { %1609 = dma.vmem_to_hbm [thread:$0]  (%p1954_p5), %s2495_s20, 512, %s2500_s24, %s2504_s9, %s1869_s12, %s1870_s13, %s1858_s21  }
 0x826 PF: > { %p1626_p12 = scmp.ge.s32.totalorder %s1843_s30, 2  ;;  %s1449_s18 = sand.u32 1, %s1831_s27  }
 0x827   : > { %p2571_p8 = scmp.ne.s32.totalorder %s2560_s16, 0  ;;  %s1450_s17 = scalar_lea.sflag [#allocation5], %s1449_s18 }
 0x829   : > { %p1619_p11 = pnand %p1626_p12, %p2571_p8 }
 0x82b   : > { %p1620_p0 = pneg %p1619_p11 }
 0x82d   : > { %1826 = dma.done.wait (%p1620_p0), %s1450_s17, 512  }
 0x82e   : > { %1828 = vsyncadd (%p1620_p0), %s1450_s17, 4294966784  ;;  %p20_p1 = scmp.ge.s32.totalorder %s1941_s11, 4   ;;  %s2572_s27 = smov %s1835_s28 }
 0x82f   : > { %s2573_s28 = smov %s1839_s29  ;;  %s2574_s29 = smov %s1952_s14 }
 0x830   : > { %s2575_s30 = smov %s1941_s11  ;;  %22 = sbr.rel (!%p20_p1) target bundleno = 5 (0x5), region = 103 }
 0x835   :  { %1455 = vsyncpa [#allocation4], 1 }
 0x836   :  { %1457 = vsyncpa [#allocation4 + $0x1], 1 }
 0x837   :  { %1458 = vsyncpa [#allocation7], 1 }
 0x838   :  { %1459 = vsyncpa [#allocation5], 1 }
 0x839   :  { %1461 = vsyncpa [#allocation5 + $0x1], 1 }

</bundles_post_ra>
